<compile_context>
chip_gen: v7x
topology: tpu7x:2x2x1
jax: 0.10.0
libtpu: 0.0.40
codegen_flags: <defaults>
</compile_context>

<pallas_src>
import jax
import jax.numpy as jnp
from jax.experimental import pallas as pl
from jax.experimental.pallas import tpu as pltpu

_LANE = 128
_SUBLANE = 8


def _round_up(x, m):
    return ((x + m - 1) // m) * m


def _pad_to(x, shape):
    pads = [(0, t - s) for s, t in zip(x.shape, shape)]
    if all(p == (0, 0) for p in pads):
        return x
    return jnp.pad(x, pads)


def _adj_apply(adj, y):
    """Per-graph A @ y on the VPU.

    adj: (Np, Np), y: (TB, Np, D)  ->  (TB, Np, D)
      out[b, n, d] = sum_m adj[n, m] * y[b, m, d]

    K = Np (8 here) is far too small to fill the MXU, so this is an unrolled
    sum of Np broadcast multiply-adds.  adj[:, m:m+1] is already a
    sublane-oriented column (no lane<->sublane relayout) and y[:, m:m+1, :] is
    a sublane slice broadcast back over the node axis.
    """
    n_pad = adj.shape[0]
    acc = adj[:, 0:1] * y[:, 0:1, :]
    for m in range(1, n_pad):
        acc = acc + adj[:, m : m + 1] * y[:, m : m + 1, :]
    return acc


def _gcn_kernel(adj_ref, x_ref, w1_ref, b1_ref, w2_ref, b2_ref, out_ref):
    tb, n_pad, _ = x_ref.shape
    adj = adj_ref[...].astype(jnp.float32)
    x = x_ref[...]

    # fc1 on the batch-flattened layout (full-height MXU pass, W1 resident).
    # (A @ X) @ W1 == A @ (X @ W1); the reshape is tile-preserving
    # (n_pad % 8 == 0, feature dims % 128 == 0) and therefore free.
    xw1 = jnp.dot(
        x.reshape(tb * n_pad, x.shape[-1]),
        w1_ref[...],
        preferred_element_type=jnp.float32,
    ).reshape(tb, n_pad, w1_ref.shape[-1])

    # Adjacency mix (VPU) + bias + relu.
    h = jnp.maximum(_adj_apply(adj, xw1) + b1_ref[...], 0.0)

    # Dropout(p=0.1) is identity in eval mode.
    # TODO(synk): training-mode dropout needs pltpu.prng_seed/prng_random_bits
    # masking AND the 1/(1-p) rescale, plus a seed input.

    # fc2 on the flattened layout, then the second adjacency mix + bias.
    # (A @ h) @ W2 == A @ (h @ W2).
    hw2 = jnp.dot(
        h.reshape(tb * n_pad, h.shape[-1]),
        w2_ref[...],
        preferred_element_type=jnp.float32,
    ).reshape(tb, n_pad, w2_ref.shape[-1])

    out = _adj_apply(adj, hw2) + b2_ref[...]
    out_ref[...] = out.astype(out_ref.dtype)


def simple_gcn_forward_batched(
    node_features, adjacency, w1, b1, w2, b2, *, batch_block=None
):
    """Batched GCN forward: one pallas_call for B graphs sharing one adjacency.

    node_features: (B, N, D_in)
    adjacency:     (N, N)
    w1: (D_in, H)   b1: (H,) or (1, H)
    w2: (H, D_out)  b2: (D_out,) or (1, D_out)
    returns (B, N, D_out) float32
    """
    B, N, d_in = node_features.shape
    h_dim = w1.shape[1]
    d_out = w2.shape[1]

    b1 = b1.reshape(1, -1)
    b2 = b2.reshape(1, -1)

    # Lane/sublane-dense padding. Zero pads are inert:
    #   * padded feature cols of X / rows of W1 contribute 0 to X@W1,
    #   * padded node rows/cols of A are 0, so padded node rows (which may be
    #     nonzero after +b1/relu) never leak into real output rows,
    #   * padded W2 cols / b2 cols only affect padded output cols (sliced off).
    n_pad = _round_up(N, _SUBLANE)
    dp = _round_up(d_in, _LANE)
    hp = _round_up(h_dim, _LANE)
    dop = _round_up(d_out, _LANE)

    # Batch blocking: at most a couple of fat grid steps (the whole working set
    # is well under 1 MiB, so grid overhead was the dominant cost at grid=(B,)).
    # Two "parallel" steps keep both v7x TensorCores busy; one step on tiny B.
    if batch_block is None:
        batch_block = max(1, min(256, -(-B // 2)))
    num_blocks = -(-B // batch_block)
    b_pad = num_blocks * batch_block

    adj_p = _pad_to(adjacency, (n_pad, n_pad))
    xp = _pad_to(node_features, (b_pad, n_pad, dp))
    w1p = _pad_to(w1, (dp, hp))
    b1p = _pad_to(b1, (1, hp))
    w2p = _pad_to(w2, (hp, dop))
    b2p = _pad_to(b2, (1, dop))

    # Advisory cost estimate on REAL (unpadded) dims and true byte sizes.
    flops = 2 * B * (
        N * N * d_in + N * d_in * h_dim + N * N * h_dim + N * h_dim * d_out
    )
    bytes_accessed = (
        adjacency.size * adjacency.dtype.itemsize
        + node_features.size * node_features.dtype.itemsize
        + w1.size * w1.dtype.itemsize
        + b1.size * b1.dtype.itemsize
        + w2.size * w2.dtype.itemsize
        + b2.size * b2.dtype.itemsize
        + B * N * d_out * 4
    )

    out_padded = pl.pallas_call(
        _gcn_kernel,
        out_shape=jax.ShapeDtypeStruct((b_pad, n_pad, dop), jnp.float32),
        grid=(num_blocks,),
        in_specs=[
            pl.BlockSpec((n_pad, n_pad), lambda i: (0, 0)),  # adjacency (resident)
            pl.BlockSpec((batch_block, n_pad, dp), lambda i: (i, 0, 0)),
            pl.BlockSpec((dp, hp), lambda i: (0, 0)),
            pl.BlockSpec((1, hp), lambda i: (0, 0)),
            pl.BlockSpec((hp, dop), lambda i: (0, 0)),
            pl.BlockSpec((1, dop), lambda i: (0, 0)),
        ],
        out_specs=pl.BlockSpec((batch_block, n_pad, dop), lambda i: (i, 0, 0)),
        compiler_params=pltpu.CompilerParams(
            dimension_semantics=("parallel",),
        ),
        cost_estimate=pl.CostEstimate(
            flops=flops, transcendentals=0, bytes_accessed=bytes_accessed
        ),
    )(adj_p, xp, w1p, b1p, w2p, b2p)

    return out_padded[:B, :N, :d_out]


def simple_gcn_forward(node_features, adjacency, w1, b1, w2, b2):
    """Single-graph forward, matching the PyTorch module signature."""
    out = simple_gcn_forward_batched(node_features[None], adjacency, w1, b1, w2, b2)
    return out[0]


def init_linear_params(key, fan_in, fan_out):
    """Deterministic nn.Linear-style init (uniform +/- 1/sqrt(fan_in))."""
    kw, kb = jax.random.split(key)
    bound = 1.0 / jnp.sqrt(jnp.float32(fan_in))
    # Stored as (fan_in, fan_out) so the kernel computes x @ W (== x @ W_pt^T).
    w = jax.random.uniform(kw, (fan_in, fan_out), jnp.float32, -bound, bound)
    b = jax.random.uniform(kb, (1, fan_out), jnp.float32, -bound, bound)
    return w, b


def reference_forward(node_features, adjacency, w1, b1, w2, b2):
    hi = jax.lax.Precision.HIGHEST
    x = jnp.dot(adjacency, node_features, precision=hi)
    x = jnp.maximum(jnp.dot(x, w1, precision=hi) + b1, 0.0)
    x = jnp.dot(adjacency, x, precision=hi)
    return jnp.dot(x, w2, precision=hi) + b2


if __name__ == "__main__":
    key = jax.random.PRNGKey(0)
    k_feat, k_adj, k_fc1, k_fc2 = jax.random.split(key, 4)

    # 8 microservice nodes, 16-dim features; 32 RL timesteps batched per launch.
    num_nodes, input_dim, hidden_dim, output_dim = 8, 16, 32, 16
    batch = 32

    node_features = jax.random.normal(
        k_feat, (batch, num_nodes, input_dim), jnp.float32
    )
    # Symmetric-ish dependency matrix with self-loops (shared across the batch).
    adj_raw = (jax.random.uniform(k_adj, (num_nodes, num_nodes)) > 0.5).astype(
        jnp.float32
    )
    adjacency = jnp.clip(
        adj_raw + adj_raw.T + jnp.eye(num_nodes, dtype=jnp.float32), 0.0, 1.0
    )

    w1, b1 = init_linear_params(k_fc1, input_dim, hidden_dim)
    w2, b2 = init_linear_params(k_fc2, hidden_dim, output_dim)

    # Batched path (two fat grid steps).
    out = simple_gcn_forward_batched(node_features, adjacency, w1, b1, w2, b2)
    out = jax.block_until_ready(out)
    assert out.shape == (batch, num_nodes, output_dim)

    ref = jax.vmap(
        lambda nf: reference_forward(nf, adjacency, w1, b1, w2, b2)
    )(node_features)
    assert jnp.allclose(out, ref, atol=2e-3, rtol=2e-3), "batched mismatch vs JAX reference"

    # Single-graph path (matches the original module's forward signature).
    out1 = simple_gcn_forward(node_features[0], adjacency, w1, b1, w2, b2)
    out1 = jax.block_until_ready(out1)
    assert out1.shape == (num_nodes, output_dim)
    assert jnp.allclose(out1, ref[0], atol=2e-3, rtol=2e-3), "single-graph mismatch"

    print("KERNEL_OK")
</pallas_src>

<mosaic_0001>
module attributes {stable_mosaic.version = 11 : i64} {
  func.func @_gcn_kernel(%arg0: i32, %arg1: memref<8x8xf32, #tpu.memory_space<vmem>>, %arg2: memref<16x8x128xf32, #tpu.memory_space<vmem>>, %arg3: memref<128x128xf32, #tpu.memory_space<vmem>>, %arg4: memref<1x128xf32, #tpu.memory_space<vmem>>, %arg5: memref<128x128xf32, #tpu.memory_space<vmem>>, %arg6: memref<1x128xf32, #tpu.memory_space<vmem>>, %arg7: memref<16x8x128xf32, #tpu.memory_space<vmem>>) attributes {dimension_semantics = [#tpu.dimension_semantics<parallel>], iteration_bounds = array<i64: 2>, scalar_prefetch = 0 : i64, scratch_operands = 0 : i64, tpu.core_type = #tpu.core_type<tc>, window_params = [{pipeline_mode = #tpu.pipeline_mode<synchronous>, transform_indices = @transform_0, window_bounds = array<i64: 8, 8>}, {transform_indices = @transform_1, window_bounds = array<i64: 16, 8, 128>}, {pipeline_mode = #tpu.pipeline_mode<synchronous>, transform_indices = @transform_2, window_bounds = array<i64: 128, 128>}, {pipeline_mode = #tpu.pipeline_mode<synchronous>, transform_indices = @transform_3, window_bounds = array<i64: 1, 128>}, {pipeline_mode = #tpu.pipeline_mode<synchronous>, transform_indices = @transform_4, window_bounds = array<i64: 128, 128>}, {pipeline_mode = #tpu.pipeline_mode<synchronous>, transform_indices = @transform_5, window_bounds = array<i64: 1, 128>}, {transform_indices = @transform_6, window_bounds = array<i64: 16, 8, 128>}]} {
    %c0 = arith.constant 0 : index
    %c0_0 = arith.constant 0 : index
    %0 = vector.load %arg1[%c0, %c0_0] : memref<8x8xf32, #tpu.memory_space<vmem>>, vector<8x8xf32>
    %c0_1 = arith.constant 0 : index
    %c0_2 = arith.constant 0 : index
    %c0_3 = arith.constant 0 : index
    %1 = vector.load %arg2[%c0_1, %c0_2, %c0_3] : memref<16x8x128xf32, #tpu.memory_space<vmem>>, vector<16x8x128xf32>
    %2 = vector.shape_cast %1 : vector<16x8x128xf32> to vector<128x128xf32>
    %c0_4 = arith.constant 0 : index
    %c0_5 = arith.constant 0 : index
    %3 = vector.load %arg3[%c0_4, %c0_5] : memref<128x128xf32, #tpu.memory_space<vmem>>, vector<128x128xf32>
    %cst = arith.constant dense<0.000000e+00> : vector<128x128xf32>
    %4 = tpu.matmul %2, %3, %cst {dimension_numbers = #tpu.dot_dimension_numbers<[1], [0], [0], [1], [0, 0, 1, 1], [], []>} : vector<128x128xf32>, vector<128x128xf32>, vector<128x128xf32> -> vector<128x128xf32>
    %5 = vector.shape_cast %4 : vector<128x128xf32> to vector<16x8x128xf32>
    %6 = vector.extract_strided_slice %0 {offsets = [0, 0], sizes = [8, 1], strides = [1, 1]} : vector<8x8xf32> to vector<8x1xf32>
    %7 = vector.extract_strided_slice %5 {offsets = [0, 0, 0], sizes = [16, 1, 128], strides = [1, 1, 1]} : vector<16x8x128xf32> to vector<16x1x128xf32>
    %8 = vector.shape_cast %6 : vector<8x1xf32> to vector<1x8x1xf32>
    %9 = vector.broadcast %8 : vector<1x8x1xf32> to vector<16x8x128xf32>
    %10 = vector.broadcast %7 : vector<16x1x128xf32> to vector<16x8x128xf32>
    %11 = arith.mulf %9, %10 : vector<16x8x128xf32>
    %12 = vector.extract_strided_slice %0 {offsets = [0, 1], sizes = [8, 1], strides = [1, 1]} : vector<8x8xf32> to vector<8x1xf32>
    %13 = vector.extract_strided_slice %5 {offsets = [0, 1, 0], sizes = [16, 1, 128], strides = [1, 1, 1]} : vector<16x8x128xf32> to vector<16x1x128xf32>
    %14 = vector.shape_cast %12 : vector<8x1xf32> to vector<1x8x1xf32>
    %15 = vector.broadcast %14 : vector<1x8x1xf32> to vector<16x8x128xf32>
    %16 = vector.broadcast %13 : vector<16x1x128xf32> to vector<16x8x128xf32>
    %17 = arith.mulf %15, %16 : vector<16x8x128xf32>
    %18 = arith.addf %11, %17 : vector<16x8x128xf32>
    %19 = vector.extract_strided_slice %0 {offsets = [0, 2], sizes = [8, 1], strides = [1, 1]} : vector<8x8xf32> to vector<8x1xf32>
    %20 = vector.extract_strided_slice %5 {offsets = [0, 2, 0], sizes = [16, 1, 128], strides = [1, 1, 1]} : vector<16x8x128xf32> to vector<16x1x128xf32>
    %21 = vector.shape_cast %19 : vector<8x1xf32> to vector<1x8x1xf32>
    %22 = vector.broadcast %21 : vector<1x8x1xf32> to vector<16x8x128xf32>
    %23 = vector.broadcast %20 : vector<16x1x128xf32> to vector<16x8x128xf32>
    %24 = arith.mulf %22, %23 : vector<16x8x128xf32>
    %25 = arith.addf %18, %24 : vector<16x8x128xf32>
    %26 = vector.extract_strided_slice %0 {offsets = [0, 3], sizes = [8, 1], strides = [1, 1]} : vector<8x8xf32> to vector<8x1xf32>
    %27 = vector.extract_strided_slice %5 {offsets = [0, 3, 0], sizes = [16, 1, 128], strides = [1, 1, 1]} : vector<16x8x128xf32> to vector<16x1x128xf32>
    %28 = vector.shape_cast %26 : vector<8x1xf32> to vector<1x8x1xf32>
    %29 = vector.broadcast %28 : vector<1x8x1xf32> to vector<16x8x128xf32>
    %30 = vector.broadcast %27 : vector<16x1x128xf32> to vector<16x8x128xf32>
    %31 = arith.mulf %29, %30 : vector<16x8x128xf32>
    %32 = arith.addf %25, %31 : vector<16x8x128xf32>
    %33 = vector.extract_strided_slice %0 {offsets = [0, 4], sizes = [8, 1], strides = [1, 1]} : vector<8x8xf32> to vector<8x1xf32>
    %34 = vector.extract_strided_slice %5 {offsets = [0, 4, 0], sizes = [16, 1, 128], strides = [1, 1, 1]} : vector<16x8x128xf32> to vector<16x1x128xf32>
    %35 = vector.shape_cast %33 : vector<8x1xf32> to vector<1x8x1xf32>
    %36 = vector.broadcast %35 : vector<1x8x1xf32> to vector<16x8x128xf32>
    %37 = vector.broadcast %34 : vector<16x1x128xf32> to vector<16x8x128xf32>
    %38 = arith.mulf %36, %37 : vector<16x8x128xf32>
    %39 = arith.addf %32, %38 : vector<16x8x128xf32>
    %40 = vector.extract_strided_slice %0 {offsets = [0, 5], sizes = [8, 1], strides = [1, 1]} : vector<8x8xf32> to vector<8x1xf32>
    %41 = vector.extract_strided_slice %5 {offsets = [0, 5, 0], sizes = [16, 1, 128], strides = [1, 1, 1]} : vector<16x8x128xf32> to vector<16x1x128xf32>
    %42 = vector.shape_cast %40 : vector<8x1xf32> to vector<1x8x1xf32>
    %43 = vector.broadcast %42 : vector<1x8x1xf32> to vector<16x8x128xf32>
    %44 = vector.broadcast %41 : vector<16x1x128xf32> to vector<16x8x128xf32>
    %45 = arith.mulf %43, %44 : vector<16x8x128xf32>
    %46 = arith.addf %39, %45 : vector<16x8x128xf32>
    %47 = vector.extract_strided_slice %0 {offsets = [0, 6], sizes = [8, 1], strides = [1, 1]} : vector<8x8xf32> to vector<8x1xf32>
    %48 = vector.extract_strided_slice %5 {offsets = [0, 6, 0], sizes = [16, 1, 128], strides = [1, 1, 1]} : vector<16x8x128xf32> to vector<16x1x128xf32>
    %49 = vector.shape_cast %47 : vector<8x1xf32> to vector<1x8x1xf32>
    %50 = vector.broadcast %49 : vector<1x8x1xf32> to vector<16x8x128xf32>
    %51 = vector.broadcast %48 : vector<16x1x128xf32> to vector<16x8x128xf32>
    %52 = arith.mulf %50, %51 : vector<16x8x128xf32>
    %53 = arith.addf %46, %52 : vector<16x8x128xf32>
    %54 = vector.extract_strided_slice %0 {offsets = [0, 7], sizes = [8, 1], strides = [1, 1]} : vector<8x8xf32> to vector<8x1xf32>
    %55 = vector.extract_strided_slice %5 {offsets = [0, 7, 0], sizes = [16, 1, 128], strides = [1, 1, 1]} : vector<16x8x128xf32> to vector<16x1x128xf32>
    %56 = vector.shape_cast %54 : vector<8x1xf32> to vector<1x8x1xf32>
    %57 = vector.broadcast %56 : vector<1x8x1xf32> to vector<16x8x128xf32>
    %58 = vector.broadcast %55 : vector<16x1x128xf32> to vector<16x8x128xf32>
    %59 = arith.mulf %57, %58 : vector<16x8x128xf32>
    %60 = arith.addf %53, %59 : vector<16x8x128xf32>
    %c0_6 = arith.constant 0 : index
    %c0_7 = arith.constant 0 : index
    %61 = vector.load %arg4[%c0_6, %c0_7] : memref<1x128xf32, #tpu.memory_space<vmem>>, vector<1x128xf32>
    %62 = vector.shape_cast %61 : vector<1x128xf32> to vector<1x1x128xf32>
    %63 = vector.broadcast %62 : vector<1x1x128xf32> to vector<16x8x128xf32>
    %64 = arith.addf %60, %63 : vector<16x8x128xf32>
    %cst_8 = arith.constant 0.000000e+00 : f32
    %65 = vector.broadcast %cst_8 : f32 to vector<16x8x128xf32>
    %66 = arith.maximumf %64, %65 : vector<16x8x128xf32>
    %67 = vector.shape_cast %66 : vector<16x8x128xf32> to vector<128x128xf32>
    %c0_9 = arith.constant 0 : index
    %c0_10 = arith.constant 0 : index
    %68 = vector.load %arg5[%c0_9, %c0_10] : memref<128x128xf32, #tpu.memory_space<vmem>>, vector<128x128xf32>
    %cst_11 = arith.constant dense<0.000000e+00> : vector<128x128xf32>
    %69 = tpu.matmul %67, %68, %cst_11 {dimension_numbers = #tpu.dot_dimension_numbers<[1], [0], [0], [1], [0, 0, 1, 1], [], []>} : vector<128x128xf32>, vector<128x128xf32>, vector<128x128xf32> -> vector<128x128xf32>
    %70 = vector.shape_cast %69 : vector<128x128xf32> to vector<16x8x128xf32>
    %71 = vector.extract_strided_slice %0 {offsets = [0, 0], sizes = [8, 1], strides = [1, 1]} : vector<8x8xf32> to vector<8x1xf32>
    %72 = vector.extract_strided_slice %70 {offsets = [0, 0, 0], sizes = [16, 1, 128], strides = [1, 1, 1]} : vector<16x8x128xf32> to vector<16x1x128xf32>
    %73 = vector.shape_cast %71 : vector<8x1xf32> to vector<1x8x1xf32>
    %74 = vector.broadcast %73 : vector<1x8x1xf32> to vector<16x8x128xf32>
    %75 = vector.broadcast %72 : vector<16x1x128xf32> to vector<16x8x128xf32>
    %76 = arith.mulf %74, %75 : vector<16x8x128xf32>
    %77 = vector.extract_strided_slice %0 {offsets = [0, 1], sizes = [8, 1], strides = [1, 1]} : vector<8x8xf32> to vector<8x1xf32>
    %78 = vector.extract_strided_slice %70 {offsets = [0, 1, 0], sizes = [16, 1, 128], strides = [1, 1, 1]} : vector<16x8x128xf32> to vector<16x1x128xf32>
    %79 = vector.shape_cast %77 : vector<8x1xf32> to vector<1x8x1xf32>
    %80 = vector.broadcast %79 : vector<1x8x1xf32> to vector<16x8x128xf32>
    %81 = vector.broadcast %78 : vector<16x1x128xf32> to vector<16x8x128xf32>
    %82 = arith.mulf %80, %81 : vector<16x8x128xf32>
    %83 = arith.addf %76, %82 : vector<16x8x128xf32>
    %84 = vector.extract_strided_slice %0 {offsets = [0, 2], sizes = [8, 1], strides = [1, 1]} : vector<8x8xf32> to vector<8x1xf32>
    %85 = vector.extract_strided_slice %70 {offsets = [0, 2, 0], sizes = [16, 1, 128], strides = [1, 1, 1]} : vector<16x8x128xf32> to vector<16x1x128xf32>
    %86 = vector.shape_cast %84 : vector<8x1xf32> to vector<1x8x1xf32>
    %87 = vector.broadcast %86 : vector<1x8x1xf32> to vector<16x8x128xf32>
    %88 = vector.broadcast %85 : vector<16x1x128xf32> to vector<16x8x128xf32>
    %89 = arith.mulf %87, %88 : vector<16x8x128xf32>
    %90 = arith.addf %83, %89 : vector<16x8x128xf32>
    %91 = vector.extract_strided_slice %0 {offsets = [0, 3], sizes = [8, 1], strides = [1, 1]} : vector<8x8xf32> to vector<8x1xf32>
    %92 = vector.extract_strided_slice %70 {offsets = [0, 3, 0], sizes = [16, 1, 128], strides = [1, 1, 1]} : vector<16x8x128xf32> to vector<16x1x128xf32>
    %93 = vector.shape_cast %91 : vector<8x1xf32> to vector<1x8x1xf32>
    %94 = vector.broadcast %93 : vector<1x8x1xf32> to vector<16x8x128xf32>
    %95 = vector.broadcast %92 : vector<16x1x128xf32> to vector<16x8x128xf32>
    %96 = arith.mulf %94, %95 : vector<16x8x128xf32>
    %97 = arith.addf %90, %96 : vector<16x8x128xf32>
    %98 = vector.extract_strided_slice %0 {offsets = [0, 4], sizes = [8, 1], strides = [1, 1]} : vector<8x8xf32> to vector<8x1xf32>
    %99 = vector.extract_strided_slice %70 {offsets = [0, 4, 0], sizes = [16, 1, 128], strides = [1, 1, 1]} : vector<16x8x128xf32> to vector<16x1x128xf32>
    %100 = vector.shape_cast %98 : vector<8x1xf32> to vector<1x8x1xf32>
    %101 = vector.broadcast %100 : vector<1x8x1xf32> to vector<16x8x128xf32>
    %102 = vector.broadcast %99 : vector<16x1x128xf32> to vector<16x8x128xf32>
    %103 = arith.mulf %101, %102 : vector<16x8x128xf32>
    %104 = arith.addf %97, %103 : vector<16x8x128xf32>
    %105 = vector.extract_strided_slice %0 {offsets = [0, 5], sizes = [8, 1], strides = [1, 1]} : vector<8x8xf32> to vector<8x1xf32>
    %106 = vector.extract_strided_slice %70 {offsets = [0, 5, 0], sizes = [16, 1, 128], strides = [1, 1, 1]} : vector<16x8x128xf32> to vector<16x1x128xf32>
    %107 = vector.shape_cast %105 : vector<8x1xf32> to vector<1x8x1xf32>
    %108 = vector.broadcast %107 : vector<1x8x1xf32> to vector<16x8x128xf32>
    %109 = vector.broadcast %106 : vector<16x1x128xf32> to vector<16x8x128xf32>
    %110 = arith.mulf %108, %109 : vector<16x8x128xf32>
    %111 = arith.addf %104, %110 : vector<16x8x128xf32>
    %112 = vector.extract_strided_slice %0 {offsets = [0, 6], sizes = [8, 1], strides = [1, 1]} : vector<8x8xf32> to vector<8x1xf32>
    %113 = vector.extract_strided_slice %70 {offsets = [0, 6, 0], sizes = [16, 1, 128], strides = [1, 1, 1]} : vector<16x8x128xf32> to vector<16x1x128xf32>
    %114 = vector.shape_cast %112 : vector<8x1xf32> to vector<1x8x1xf32>
    %115 = vector.broadcast %114 : vector<1x8x1xf32> to vector<16x8x128xf32>
    %116 = vector.broadcast %113 : vector<16x1x128xf32> to vector<16x8x128xf32>
    %117 = arith.mulf %115, %116 : vector<16x8x128xf32>
    %118 = arith.addf %111, %117 : vector<16x8x128xf32>
    %119 = vector.extract_strided_slice %0 {offsets = [0, 7], sizes = [8, 1], strides = [1, 1]} : vector<8x8xf32> to vector<8x1xf32>
    %120 = vector.extract_strided_slice %70 {offsets = [0, 7, 0], sizes = [16, 1, 128], strides = [1, 1, 1]} : vector<16x8x128xf32> to vector<16x1x128xf32>
    %121 = vector.shape_cast %119 : vector<8x1xf32> to vector<1x8x1xf32>
    %122 = vector.broadcast %121 : vector<1x8x1xf32> to vector<16x8x128xf32>
    %123 = vector.broadcast %120 : vector<16x1x128xf32> to vector<16x8x128xf32>
    %124 = arith.mulf %122, %123 : vector<16x8x128xf32>
    %125 = arith.addf %118, %124 : vector<16x8x128xf32>
    %c0_12 = arith.constant 0 : index
    %c0_13 = arith.constant 0 : index
    %126 = vector.load %arg6[%c0_12, %c0_13] : memref<1x128xf32, #tpu.memory_space<vmem>>, vector<1x128xf32>
    %127 = vector.shape_cast %126 : vector<1x128xf32> to vector<1x1x128xf32>
    %128 = vector.broadcast %127 : vector<1x1x128xf32> to vector<16x8x128xf32>
    %129 = arith.addf %125, %128 : vector<16x8x128xf32>
    %c0_14 = arith.constant 0 : index
    %c0_15 = arith.constant 0 : index
    %c0_16 = arith.constant 0 : index
    %130 = vector.load %arg7[%c0_14, %c0_15, %c0_16] : memref<16x8x128xf32, #tpu.memory_space<vmem>>, vector<16x8x128xf32>
    tpu.vector_store %arg7[%c0_14, %c0_15, %c0_16], %129 {strides = array<i32>} : memref<16x8x128xf32, #tpu.memory_space<vmem>>, vector<16x8x128xf32>,
    return
  }
  func.func @transform_0(%arg0: i32) -> (i32, i32) {
    %c0_i32 = arith.constant 0 : i32
    %c0_i32_0 = arith.constant 0 : i32
    %c0_i32_1 = arith.constant 0 : i32
    return %c0_i32, %c0_i32_0 : i32, i32
  }
  func.func @transform_1(%arg0: i32) -> (i32, i32, i32) {
    %c0_i32 = arith.constant 0 : i32
    %c0_i32_0 = arith.constant 0 : i32
    %c0_i32_1 = arith.constant 0 : i32
    return %arg0, %c0_i32, %c0_i32_0 : i32, i32, i32
  }
  func.func @transform_2(%arg0: i32) -> (i32, i32) {
    %c0_i32 = arith.constant 0 : i32
    %c0_i32_0 = arith.constant 0 : i32
    %c0_i32_1 = arith.constant 0 : i32
    return %c0_i32, %c0_i32_0 : i32, i32
  }
  func.func @transform_3(%arg0: i32) -> (i32, i32) {
    %c0_i32 = arith.constant 0 : i32
    %c0_i32_0 = arith.constant 0 : i32
    %c0_i32_1 = arith.constant 0 : i32
    return %c0_i32, %c0_i32_0 : i32, i32
  }
  func.func @transform_4(%arg0: i32) -> (i32, i32) {
    %c0_i32 = arith.constant 0 : i32
    %c0_i32_0 = arith.constant 0 : i32
    %c0_i32_1 = arith.constant 0 : i32
    return %c0_i32, %c0_i32_0 : i32, i32
  }
  func.func @transform_5(%arg0: i32) -> (i32, i32) {
    %c0_i32 = arith.constant 0 : i32
    %c0_i32_0 = arith.constant 0 : i32
    %c0_i32_1 = arith.constant 0 : i32
    return %c0_i32, %c0_i32_0 : i32, i32
  }
  func.func @transform_6(%arg0: i32) -> (i32, i32, i32) {
    %c0_i32 = arith.constant 0 : i32
    %c0_i32_0 = arith.constant 0 : i32
    %c0_i32_1 = arith.constant 0 : i32
    return %arg0, %c0_i32, %c0_i32_0 : i32, i32, i32
  }
}

</mosaic_0001>

<bundles_post_ra>
// kernel: tpu_custom_call.1
= control target key start
LH: loop header
LB: loop body
LE: loop exit
PB: predicated region body
PF: predicated region fallthrough
CT: control target
= control target key end

     0   :  { %11 = vsyncpa [#allocation3], 0  ;;  %s4280_s0 = inlined_call_operand.hbm [shape: f32[8,8], index: 0, kind: input, shape index: {}]   ;;  %s4281_s1 = inlined_call_operand.hbm [shape: f32[32,8,128], index: 1, kind: input, shape index: {}]   ;;  %s4282_s2 = inlined_call_operand.hbm [shape: f32[128,128], index: 2, kind: input, shape index: {}]   ;;  %s4283_s3 = inlined_call_operand.vmem [shape: f32[1,128], index: 3, kind: input, shape index: {}]   ;;  %s4284_s4 = inlined_call_operand.hbm [shape: f32[128,128], index: 4, kind: input, shape index: {}]   ;;  %s4285_s5 = inlined_call_operand.vmem [shape: f32[1,128], index: 5, kind: input, shape index: {}]   ;;  %s4286_s6 = inlined_call_operand.hbm [shape: f32[32,8,128], index: 6, kind: output, shape index: {}]  }
   0x1   :  { %12 = vsyncpa [#allocation6], 0 }
   0x2   :  { %14 = vsyncpa [#allocation6 + $0x1], 0 }
   0x3   :  { %15 = vsyncpa [#allocation9], 0 }
   0x4   :  { %16 = vsyncpa [#allocation4], 0 }
   0x5   :  { %18 = vsyncpa [#allocation4 + $0x1], 0  ;;  %s2994_s21 = smov 0   ;;  %s2996_s22 = smov 0  }
   0x6   :  { %s2998_s23 = smov 0   ;;  %s3000_s24 = smov 0  }
   0x7 LB: > { %s3015_s25 = sadd.s32 4294967295, %s2940_s24   ;;  %s2386_s26 = sadd.s32 4294967294, %s2940_s24   ;;  %s2940_s24 = sphi %s3000_s24, %s4343_s24   ;;  %s2936_s23 = sphi %s2998_s23, %s4347_s23   ;;  %s2932_s22 = sphi %s2996_s22, %s4346_s22   ;;  %s2928_s21 = sphi %s2994_s21, %s4345_s21  }
   0x8   : > { %s3019_s27 = sadd.s32 1, %s2940_s24   ;;  %s52_s28 = sadd.s32 1, %s2936_s23 }
   0x9   : > { %4298 = sst [smem:[#allocation16_spill]] %s3019_s27  ;;  %s49_s29 = ssub.s32 %s2940_s24, %s3019_s27 }
   0xa   : > { %p59_p0 = scmp.ne.s32.totalorder %s2936_s23, %s2932_s22  ;;  %p50_p1 = scmp.eq.s32.totalorder %s49_s29, 0 }
   0xb   : > { %p60_p2 = scmp.eq.s32.totalorder %s2940_s24, 0  ;;  %p65_p3 = scmp.ne.s32.totalorder %s2932_s22, %s2928_s21 }
   0xc   : > { %p4287_p4 = scmp.eq.s32.totalorder %s3015_s25, 0  ;;  %p173_p7 = scmp.eq.s32.totalorder %s3015_s25, 1 }
   0xd   : > { %s3031_s30 = scalar_select %p50_p1, %s2936_s23, %s52_s28  }
   0xe   : > { %p3033_p5 = por %p60_p2, %p59_p0  ;;  %p3039_p6 = por %p4287_p4, %p65_p3 }
   0xf   : > { %4299 = sst [smem:[#allocation17_spill]] %s3031_s30  ;;  %p179_p8 = scmp.eq.s32.totalorder %s2386_s26, 1 }
  0x10   : > { %s4300_s7 = scalar_select %p3033_p5, 1, 0 }
  0x11   : > { %s4301_s8 = scalar_select %p3039_p6, 1, 0 }
  0x12   : > { %p2387_p9 = scmp.ge.s32.totalorder %s2940_s24, 1  ;;  %p186_p10 = scmp.lt.s32.totalorder %s2940_s24, 3 }
  0x13   : > { %p3046_p11 = por %p173_p7, %p59_p0  ;;  %p3050_p12 = por %p179_p8, %p65_p3 }
  0x14   : > { %p3054_p13 = pnand %p2387_p9, %p186_p10  ;;  %s2942_s12 = smov [#allocation7]  }
  0x15   : > { %s4302_s9 = scalar_select %p3046_p11, 1, 0 }
  0x16   : > { %s4303_s10 = scalar_select %p3050_p12, 1, 0 }
  0x17   : > { %s4304_s11 = scalar_select %p3054_p13, 1, 0 }
  0x18   : > { %p2666_p1 = pneg %p3054_p13  ;;  %s209_s13 = sshll.u32 %s2942_s12, 4  ;;  %s210_s13 = int_to_ptr.vmem [resolvable:$true] %s209_s13 }
  0x19   : > { %s2943_s15 = smov [#allocation2]   ;;  %s2748_s19 = scalar_lea.hbm %s4282_s2, 2048 }
  0x1a   : > { %p3062_p2 = pnand %p2666_p1, %p4287_p4  ;;  %s199_s16 = sshll.u32 %s2943_s15, 4  ;;  %s200_s16 = int_to_ptr.vmem [resolvable:$true] %s199_s16 }
  0x1b   : > { %p2749_p7 = scmp.ne.s32.totalorder %s4282_s2, %s2748_s19  ;;  %p2755_p1 = scmp.lt.u32.totalorder %s2748_s19, %s4282_s2 }
  0x1c   : > { %p3076_p8 = pneg %p3062_p2 }
  0x1e   : > { %p2751_p9 = pnand %p3076_p8, %p2749_p7 }
  0x20   : > { %p2752_p10 = pneg %p2751_p9 }
  0x22   : > { %p2757_p0 = pnand %p2755_p1, %p2752_p10 }
  0x24   : > { %2760 = shalt.err (!%p2757_p0)
}
  0x25   : > { %s2761_s15 = scalar_lea.vmem %s210_s13, 2048  ;;  %p2769_p11 = scmp.lt.s32.totalorder %s210_s13, %s210_s13 }
  0x26   : > { %p2762_p4 = scmp.ne.s32.totalorder %s210_s13, %s2761_s15  ;;  %p2770_p6 = scmp.lt.s32.totalorder %s2761_s15, %s2761_s15 }
  0x28   : > { %p2764_p3 = pnand %p2762_p4, %p3076_p8  ;;  %p2771_p13 = por %p2770_p6, %p2769_p11 }
  0x2a   : > { %p2765_p12 = pneg %p2764_p3 }
  0x2c   : > { %p2772_p5 = pnand %p2771_p13, %p2765_p12 }
  0x2e   : > { %2775 = shalt.err (!%p2772_p5)
}
  0x2f   : > { %s4294_s17 = smov 128   ;;  %s4296_s18 = smov 8  }
  0x30   : > { %2672 = dma.hbm_to_vmem [thread:$0]  (!%p3062_p2), %s4282_s2, 2048, %s210_s13, [#allocation6], %s4294_s17, %s4294_s17, %s4296_s18  }
  0x31   : > { %p4307_p4 = scmp.ne.s32.totalorder %s4300_s7, 0  ;;  %p4308_p0 = scmp.lt.s32.totalorder %s2940_s24, 2 }
  0x32   : > { %s2776_s15 = scalar_lea.hbm %s4280_s0, 128 }
  0x33   : > { %p3099_p3 = pnand %p4308_p0, %p4307_p4  ;;  %p2777_p5 = scmp.ne.s32.totalorder %s4280_s0, %s2776_s15 }
  0x34   : > { %p2783_p12 = scmp.lt.u32.totalorder %s2776_s15, %s4280_s0 }
  0x35   : > { %s4309_s26 = scalar_select %p3099_p3, 1, 0 }
  0x36   : > { %p2779_p6 = pnand %p2777_p5, %p3076_p8 }
  0x38   : > { %p2780_p11 = pneg %p2779_p6 }
  0x3a   : > { %p2785_p13 = pnand %p2783_p12, %p2780_p11 }
  0x3c   : > { %2788 = shalt.err (!%p2785_p13)
}
  0x3d   : > { %s2789_s7 = scalar_lea.vmem %s200_s16, 128  ;;  %p2797_p1 = scmp.lt.s32.totalorder %s200_s16, %s200_s16 }
  0x3e   : > { %p2790_p7 = scmp.ne.s32.totalorder %s200_s16, %s2789_s7  ;;  %p2798_p4 = scmp.lt.s32.totalorder %s2789_s7, %s2789_s7 }
  0x40   : > { %p2792_p9 = pnand %p2790_p7, %p3076_p8  ;;  %p2799_p0 = por %p2798_p4, %p2797_p1 }
  0x42   : > { %p2793_p10 = pneg %p2792_p9 }
  0x44   : > { %p2800_p3 = pnand %p2799_p0, %p2793_p10 }
  0x46   : > { %2803 = shalt.err (!%p2800_p3)
}
  0x47   : > { %2669 = dma.hbm_to_vmem [thread:$0]  (!%p3062_p2), %s4280_s0, 128, %s200_s16, [#allocation3]  }
  0x48   : > { %s2946_s20 = smov [#allocation8]   ;;  %s242_s12 = sand.u32 1, %s2940_s24  }
  0x49   : > { %s225_s29 = sshll.u32 %s2946_s20, 4  ;;  %s2804_s13 = scalar_lea.hbm %s4284_s4, 2048  ;;  %s226_s29 = int_to_ptr.vmem [resolvable:$true] %s225_s29 }
  0x4a   : > { %p2805_p3 = scmp.ne.s32.totalorder %s4284_s4, %s2804_s13  ;;  %p2811_p11 = scmp.lt.u32.totalorder %s2804_s13, %s4284_s4 }
  0x4c   : > { %p2807_p5 = pnand %p2805_p3, %p3076_p8 }
  0x4e   : > { %p2808_p6 = pneg %p2807_p5 }
  0x50   : > { %p2813_p12 = pnand %p2811_p11, %p2808_p6 }
  0x52   : > { %2816 = shalt.err (!%p2813_p12)
}
  0x53   : > { %s2817_s16 = scalar_lea.vmem %s226_s29, 2048  ;;  %p2825_p10 = scmp.lt.s32.totalorder %s226_s29, %s226_s29 }
  0x54   : > { %p2818_p13 = scmp.ne.s32.totalorder %s226_s29, %s2817_s16  ;;  %p2826_p1 = scmp.lt.s32.totalorder %s2817_s16, %s2817_s16 }
  0x56   : > { %p2820_p7 = pnand %p2818_p13, %p3076_p8  ;;  %p2827_p4 = por %p2826_p1, %p2825_p10 }
  0x58   : > { %p2821_p9 = pneg %p2820_p7 }
  0x5a   : > { %p2828_p0 = pnand %p2827_p4, %p2821_p9 }
  0x5c   : > { %2831 = shalt.err (!%p2828_p0)
}
  0x5d   : > { %s4310_s17 = smov 8   ;;  %s4311_s30 = smov 128  }
  0x5e   : > { %2675 = dma.hbm_to_vmem [thread:$0]  (!%p3062_p2), %s4284_s4, 2048, %s226_s29, [#allocation9], %s4311_s30, %s4311_s30, %s4310_s17  }
  0x5f   : > { %s244_s28 = sand.u32 1, %s2936_s23   ;;  %s2408_s15 = sshll.u32 %s2940_s24, 11 }
  0x60   : > { %s2392_s19 = sshll.u32 %s244_s28, 7  ;;  %s3148_s27 = scalar_lea.hbm %s4281_s1, %s2408_s15 }
  0x61   : > { %s246_s14 = scalar_lea.vmem [#allocation5], %s2392_s19  ;;  %s3152_s18 = scalar_lea.sflag [#allocation6], %s242_s12 }
  0x62   : > { %s253_s16 = sshll.u32 %s246_s14, 4  ;;  %s2832_s20 = scalar_lea.hbm %s3148_s27, 2048  ;;  %s3150_s16 = int_to_ptr.vmem [resolvable:$true] %s253_s16 }
  0x63   : > { %p2833_p2 = scmp.ne.s32.totalorder %s3148_s27, %s2832_s20  ;;  %p4312_p8 = scmp.ne.s32.totalorder %s4309_s26, 0 }
  0x64   : > { %s2837_s15 = scalar_lea.hbm %s4281_s1, 4096  ;;  %p2838_p11 = scmp.lt.u32.totalorder %s3148_s27, %s4281_s1 }
  0x65   : > { %p2834_p3 = pneg %p4312_p8  ;;  %p2839_p12 = scmp.lt.u32.totalorder %s2837_s15, %s2832_s20 }
  0x66   : > { %p2841_p7 = scmp.lt.u32.totalorder %s2832_s20, %s3148_s27 }
  0x67   : > { %p2835_p5 = pnand %p2834_p3, %p2833_p2  ;;  %p2840_p13 = por %p2839_p12, %p2838_p11 }
  0x69   : > { %p2836_p6 = pneg %p2835_p5  ;;  %p2842_p9 = por %p2841_p7, %p2840_p13 }
  0x6b   : > { %p2843_p10 = pnand %p2842_p9, %p2836_p6 }
  0x6d   : > { %2846 = shalt.err (!%p2843_p10)
}
  0x6e   : > { %s2847_s12 = scalar_lea.vmem %s3150_s16, 2048  ;;  %s2947_s19 = smov [#allocation5]  }
  0x6f   : > { %p2848_p1 = scmp.ne.s32.totalorder %s3150_s16, %s2847_s12  ;;  %s2852_s14 = sshll.u32 %s2947_s19, 4  ;;  %s2853_s14 = int_to_ptr.vmem [resolvable:$false] %s2852_s14 }
  0x70   : > { %s2854_s29 = scalar_lea.vmem %s2853_s14, 4096  ;;  %p2855_p2 = scmp.lt.s32.totalorder %s3150_s16, %s2853_s14 }
  0x71   : > { %p2850_p4 = pnand %p2848_p1, %p2834_p3  ;;  %p2856_p5 = scmp.lt.s32.totalorder %s2854_s29, %s2847_s12 }
  0x73   : > { %p2851_p0 = pneg %p2850_p4  ;;  %p2857_p11 = por %p2856_p5, %p2855_p2 }
  0x75   : > { %p2858_p12 = pnand %p2857_p11, %p2851_p0 }
  0x77   : > { %2861 = shalt.err (!%p2858_p12)
}
  0x78   : > { %2679 = dma.hbm_to_vmem [thread:$0]  (!%p4312_p8), %s3148_s27, 2048, %s3150_s16, %s3152_s18, %s4311_s30, %s4311_s30, %s4310_s17  }
  0x79   : > { %p4313_p3 = scmp.ne.s32.totalorder %s4304_s11, 0 }
  0x7a   : > { %p4314_p6 = scmp.eq.s32.totalorder (!%p4313_p3), %s3015_s25, 0 }
  0x7b   : > { %265 = sbr.rel (%p4313_p3) target bundleno = 753 (0x2f1), region = 44 }
  0x82   : > { %2907 = dma.done.wait (%p4314_p6), [#allocation3], 128   ;;  %p4315_p13 = pmov %p4314_p6 }
  0x83   : > { %s271_s26 = sand.u32 1, %s3015_s25   ;;  %s273_s20 = sand.u32 1, %s2932_s22  }
  0x84   : > { %2909 = vsyncadd (%p4315_p13), [#allocation3], 4294967168  ;;  %s3193_s28 = sshll.u32 %s273_s20, 7  ;;  %s272_s17 = scalar_lea.sflag [#allocation6], %s271_s26 }
  0x85   : > { %s3196_s30 = scalar_lea.vmem [#allocation5], %s3193_s28  ;;  %p4316_p8 = scmp.ne.s32.totalorder %s4301_s8, 0 }
  0x87   : > { %2911 = dma.done.wait (%p4316_p8), %s272_s17, 2048  }
  0x88   : > { %2913 = vsyncadd (%p4316_p8), %s272_s17, 4294965248  ;;  %p4317_p7 = pmov %p4314_p6 }
  0x89   : > { %p4318_p9 = pmov %p4314_p6 }
  0x8a   : > { %2915 = dma.done.wait (%p4317_p7), [#allocation6], 2048  }
  0x8b   : > { %2917 = vsyncadd (%p4318_p9), [#allocation6], 4294965248  ;;  %p4319_p10 = pmov %p4314_p6 }
  0x8c   : > { %p4320_p1 = pmov %p4314_p6 }
  0x8d   : > { %2919 = dma.done.wait (%p4319_p10), [#allocation9], 2048  }
  0x8e   : > { %2921 = vsyncadd (%p4320_p1), [#allocation9], 4294965248  ;;  %v2948_v0 = vmov 2   ;;  %v2949_v1 = vmov 0   ;;  %v331_v2 = vld [vmem:[#allocation7] sm:$0xff]  ;;  %v332_v3 = vld [vmem:[#allocation7 + $0x8] sm:$0xff] }
  0x8f   : > { %2741 = vset.pattern.permute.xlu1 %v2948_v0  ;;  %2739 = vset.pattern.permute.xlu0 %v2949_v1  ;;  %v333_v4 = vld [vmem:[#allocation7 + $0x10] sm:$0xff]  ;;  %v2586_v5 = vpack.c.bf16 %v332_v3, %v331_v2  ;;  %v334_v6 = vld [vmem:[#allocation7 + $0x18] sm:$0xff]  ;;  %v335_v8 = vld [vmem:[#allocation7 + $0x20] sm:$0xff]  ;;  %v2950_v21 = vmov 3   ;;  %v2951_v22 = vmov 1   ;;  %v2952_v29 = vmov 4  }
  0x90   : > { %v2590_v7 = vpack.c.bf16 %v334_v6, %v333_v4  ;;  %v336_v9 = vld [vmem:[#allocation7 + $0x28] sm:$0xff]  ;;  %v315_v11 = vld [vmem:[%s3196_s30] sm:$0xff]  ;;  %v337_v12 = vld [vmem:[#allocation7 + $0x30] sm:$0xff]  ;;  %v2953_v36 = vmov 5   ;;  %v2954_v38 = vmov 6   ;;  %v2955_v39 = vmov 7  }
  0x91   : > { %2587 = vmatprep.subr.bf16.mxu0 %v2586_v5  ;;  %v2594_v10 = vpack.c.bf16 %v336_v9, %v335_v8  ;;  %v338_v13 = vld [vmem:[#allocation7 + $0x38] sm:$0xff]  ;;  %2506 = vmatprep.mubr.f32.mxu0 %v315_v11  ;;  %v339_v15 = vld [vmem:[#allocation7 + $0x40] sm:$0xff]  ;;  %v340_v16 = vld [vmem:[#allocation7 + $0x48] sm:$0xff]  ;;  %v497_v11 = vlaneseq  ;;  %s3855_s18 = scalar_lea.vmem [#allocation10], %s3193_s28  ;;  %s2409_s15 = sshll.u32 %s3015_s25, 11 }
  0x92   : > { %2589 = vmatpush3.bf16.msra.mxu0 %v2586_v5  ;;  %v2598_v14 = vpack.c.bf16 %v338_v13, %v337_v12  ;;  %v314_v17 = vld [vmem:[#allocation2] sm:$0xff]  ;;  %v2602_v18 = vpack.c.bf16 %v340_v16, %v339_v15  ;;  %v341_v19 = vld [vmem:[#allocation7 + $0x50] sm:$0xff]  ;;  %v1316_v23 = vld [vmem:[#allocation8] sm:$0xff]  ;;  %s2282_s13 = sshll.u32 %s3855_s18, 4  ;;  %s4230_s19 = scalar_lea.hbm %s4286_s6, %s2409_s15  ;;  %s4232_s13 = int_to_ptr.vmem [resolvable:$true] %s2282_s13 }
  0x93   : > { %2591 = vmatprep.subr.bf16.mxu0 %v2590_v7  ;;  %678 = vperm.xlu1 %2741, %v314_v17   ;;  %v342_v20 = vld [vmem:[#allocation7 + $0x58] sm:$0xff]  ;;  %v1317_v24 = vld [vmem:[#allocation8 + $0x8] sm:$0xff]  ;;  %v343_v27 = vld [vmem:[#allocation7 + $0x60] sm:$0xff]  ;;  %s4238_s14 = scalar_lea.sflag [#allocation4], %s273_s20  ;;  %s2862_s25 = scalar_lea.vmem %s4232_s13, 2048 }
  0x94   : > { %494 = vperm.xlu0 %2739, %v314_v17   ;;  %v2618_v25 = vpack.c.bf16 %v1317_v24, %v1316_v23  ;;  %v2606_v26 = vpack.c.bf16 %v342_v20, %v341_v19  ;;  %v344_v28 = vld [vmem:[#allocation7 + $0x68] sm:$0xff]  ;;  %v1318_v30 = vld [vmem:[#allocation8 + $0x10] sm:$0xff]  ;;  %v1319_v31 = vld [vmem:[#allocation8 + $0x18] sm:$0xff]  ;;  %p2863_p4 = scmp.ne.s32.totalorder %s4232_s13, %s2862_s25  ;;  %p4340_p0 = scmp.ne.s32.totalorder %s4302_s9, 0 }
  0x95   : > { %v2610_v32 = vpack.c.bf16 %v344_v28, %v343_v27  ;;  %v2622_v33 = vpack.c.bf16 %v1319_v31, %v1318_v30  ;;  %v345_v34 = vld [vmem:[#allocation7 + $0x70] sm:$0xff]  ;;  %v346_v35 = vld [vmem:[#allocation7 + $0x78] sm:$0xff]  ;;  %v316_v40 = vld [vmem:[%s3196_s30 + $0x8] sm:$0xff]  ;;  %s2956_s29 = smov [#allocation10]  }
  0x96   : > { %2593 = vmatpush3.bf16.msra.mxu0 %v2590_v7  ;;  %2619 = vmatprep.subr.bf16.mxu1 %v2618_v25  ;;  %v2614_v37 = vpack.c.bf16 %v346_v35, %v345_v34  ;;  %v317_v41 = vld [vmem:[%s3196_s30 + $0x10] sm:$0xff]  ;;  %v318_v42 = vld [vmem:[%s3196_s30 + $0x18] sm:$0xff]  ;;  %v319_v43 = vld [vmem:[%s3196_s30 + $0x20] sm:$0xff]  ;;  %p2864_p2 = pnand %p2863_p4, %p4340_p0  ;;  %s2866_s26 = sshll.u32 %s2956_s29, 4  ;;  %s2867_s26 = int_to_ptr.vmem [resolvable:$false] %s2866_s26 }
  0x97   : > { %2595 = vmatprep.subr.bf16.mxu0 %v2594_v10  ;;  %2742 = vset.pattern.permute.xlu1 %v2950_v21  ;;  %v320_v44 = vld [vmem:[%s3196_s30 + $0x28] sm:$0xff]  ;;  %v321_v45 = vld [vmem:[%s3196_s30 + $0x30] sm:$0xff]  ;;  %v322_v46 = vld [vmem:[%s3196_s30 + $0x38] sm:$0xff]  ;;  %s2868_s28 = scalar_lea.vmem %s2867_s26, 4096  ;;  %p2869_p11 = scmp.lt.s32.totalorder %s4232_s13, %s2867_s26 }
  0x98   : > { %2740 = vset.pattern.permute.xlu0 %v2951_v22  ;;  %778 = vperm.xlu1 %2742, %v314_v17   ;;  %v323_v47 = vld [vmem:[%s3196_s30 + $0x40] sm:$0xff]  ;;  %v324_v48 = vld [vmem:[%s3196_s30 + $0x48] sm:$0xff]  ;;  %v325_v49 = vld [vmem:[%s3196_s30 + $0x50] sm:$0xff]  ;;  %p2865_p5 = pneg %p2864_p2  ;;  %p2870_p12 = scmp.lt.s32.totalorder %s2868_s28, %s2862_s25 }
  0x99   : > { %578 = vperm.xlu0 %2740, %v314_v17   ;;  %2621 = vmatpush3.bf16.msra.mxu1 %v2618_v25  ;;  %v326_v50 = vld [vmem:[%s3196_s30 + $0x58] sm:$0xff]  ;;  %v327_v51 = vld [vmem:[%s3196_s30 + $0x60] sm:$0xff]  ;;  %v328_v52 = vld [vmem:[%s3196_s30 + $0x68] sm:$0xff] }
  0x9a   : > { %2597 = vmatpush3.bf16.msra.mxu0 %v2594_v10  ;;  %2623 = vmatprep.subr.bf16.mxu1 %v2622_v33  ;;  %v329_v53 = vld [vmem:[%s3196_s30 + $0x70] sm:$0xff]  ;;  %v330_v54 = vld [vmem:[%s3196_s30 + $0x78] sm:$0xff]  ;;  %v1320_v55 = vld [vmem:[#allocation8 + $0x20] sm:$0xff]  ;;  %p2871_p3 = por %p2870_p12, %p2869_p11 }
  0x9b   : > { %2599 = vmatprep.subr.bf16.mxu0 %v2598_v14  ;;  %v1321_v56 = vld [vmem:[#allocation8 + $0x28] sm:$0xff]  ;;  %v1322_v58 = vld [vmem:[#allocation8 + $0x30] sm:$0xff]  ;;  %v1323_v59 = vld [vmem:[#allocation8 + $0x38] sm:$0xff] }
  0x9c   : > { %2743 = vset.pattern.permute.xlu1 %v2952_v29  ;;  %v2626_v57 = vpack.c.bf16 %v1321_v56, %v1320_v55  ;;  %v2630_v60 = vpack.c.bf16 %v1323_v59, %v1322_v58  ;;  %v1324_v61 = vld [vmem:[#allocation8 + $0x40] sm:$0xff]  ;;  %v1325_v62 = vld [vmem:[#allocation8 + $0x48] sm:$0xff]  ;;  %v1326_v0 = vld [vmem:[#allocation8 + $0x50] sm:$0xff]  ;;  %p2872_p6 = pnand %p2871_p3, %p2865_p5 }
  0x9d   : > { %878 = vperm.xlu1 %2743, %v314_v17   ;;  %2744 = vset.pattern.permute.xlu0 %v2953_v36  ;;  %v2634_v63 = vpack.c.bf16 %v1325_v62, %v1324_v61  ;;  %v1327_v1 = vld [vmem:[#allocation8 + $0x58] sm:$0xff]  ;;  %v1328_v3 = vld [vmem:[#allocation8 + $0x60] sm:$0xff]  ;;  %v1329_v4 = vld [vmem:[#allocation8 + $0x68] sm:$0xff] }
  0x9e   : > { %2601 = vmatpush3.bf16.msra.mxu0 %v2598_v14  ;;  %978 = vperm.xlu0 %2744, %v314_v17   ;;  %v2638_v2 = vpack.c.bf16 %v1327_v1, %v1326_v0  ;;  %v2642_v5 = vpack.c.bf16 %v1329_v4, %v1328_v3  ;;  %v1330_v6 = vld [vmem:[#allocation8 + $0x70] sm:$0xff]  ;;  %v1331_v7 = vld [vmem:[#allocation8 + $0x78] sm:$0xff]  ;;  %v498_v14 = vshrl.u32 %v497_v11, 7 }
  0x9f   : > { %2603 = vmatprep.subr.bf16.mxu0 %v2602_v18  ;;  %2625 = vmatpush3.bf16.msra.mxu1 %v2622_v33  ;;  %v2646_v8 = vpack.c.bf16 %v1331_v7, %v1330_v6 }
  0xa0   : > { %2627 = vmatprep.subr.bf16.mxu1 %v2626_v57  ;;  %v3234_v15 = vsub.s32 0, %v498_v14  ;;  %v3236_v16 = vsub.s32 1, %v498_v14  ;;  %v3244_v20 = vsub.s32 4, %v498_v14  ;;  %v3250_v23 = vsub.s32 5, %v498_v14 }
  0xa1   : > { %2745 = vset.pattern.permute.xlu1 %v2954_v38  ;;  %v3252_v25 = vsub.s32 6, %v498_v14 }
  0xa2   : > { %2605 = vmatpush3.bf16.msra.mxu0 %v2602_v18  ;;  %1078 = vperm.xlu1 %2745, %v314_v17   ;;  %v3240_v18 = vsub.s32 3, %v498_v14 }
  0xa3   : > { %2607 = vmatprep.subr.bf16.mxu0 %v2606_v26  ;;  %2747 = vset.pattern.permute.xlu0 %v2955_v39 }
  0xa4   : > { %2629 = vmatpush3.bf16.msra.mxu1 %v2626_v57 }
  0xa5   : > { %2631 = vmatprep.subr.bf16.mxu1 %v2630_v60 }
  0xa6   : > { %2609 = vmatpush3.bf16.msra.mxu0 %v2606_v26  ;;  %2746 = vset.pattern.permute.xlu1 %v2955_v39  ;;  %v3254_v26 = vsub.s32 7, %v498_v14 }
  0xa7   : > { %2611 = vmatprep.subr.bf16.mxu0 %v2610_v32  ;;  %1178 = vperm.xlu1 %2746, %v314_v17   ;;  %v3238_v17 = vsub.s32 2, %v498_v14 }
  0xa8   : > { %2633 = vmatpush3.bf16.msra.mxu1 %v2630_v60 }
  0xa9   : > { %2635 = vmatprep.subr.bf16.mxu1 %v2634_v63 }
  0xaa   : > { %2613 = vmatpush3.bf16.msra.mxu0 %v2610_v32 }
  0xab   : > { %2615 = vmatprep.subr.bf16.mxu0 %v2614_v37 }
  0xac   : > { %2637 = vmatpush3.bf16.msra.mxu1 %v2634_v63 }
  0xad   : > { %2639 = vmatprep.subr.bf16.mxu1 %v2638_v2 }
  0xae   : > { %2617 = vmatpush3.bf16.msra.mxu0 %v2614_v37 }
  0xb0   : > { %2641 = vmatpush3.bf16.msra.mxu1 %v2638_v2 }
  0xb1   : > { %2507 = vmatmul.mubr.f32.vlgmr.msra.gmra.mrb[0].mxu0 %v316_v40  ;;  %2643 = vmatprep.subr.bf16.mxu1 %v2642_v5 }
  0xb2   : > { %2509 = vmatprep.mubr.f32.mxu0 %v317_v41 }
  0xb4   : > { %2645 = vmatpush3.bf16.msra.mxu1 %v2642_v5 }
  0xb5   : > { %2510 = vmatmul.mubr.f32.gmra.mrb[2].mxu0 %v318_v42  ;;  %2647 = vmatprep.subr.bf16.mxu1 %v2646_v8 }
  0xb6   : > { %2512 = vmatprep.mubr.f32.mxu0 %v319_v43 }
  0xb8   : > { %2649 = vmatpush3.bf16.msra.mxu1 %v2646_v8 }
  0xb9   : > { %2513 = vmatmul.mubr.f32.gmra.mrb[4].mxu0 %v320_v44 }
  0xba   : > { %2515 = vmatprep.mubr.f32.mxu0 %v321_v45 }
  0xbd   : > { %2516 = vmatmul.mubr.f32.gmra.mrb[6].mxu0 %v322_v46 }
  0xbe   : > { %2518 = vmatprep.mubr.f32.mxu0 %v323_v47 }
  0xc1   : > { %2519 = vmatmul.mubr.f32.gmra.mrb[8].mxu0 %v324_v48 }
  0xc2   : > { %2521 = vmatprep.mubr.f32.mxu0 %v325_v49 }
  0xc5   : > { %2522 = vmatmul.mubr.f32.gmra.mrb[10].mxu0 %v326_v50 }
  0xc6   : > { %2524 = vmatprep.mubr.f32.mxu0 %v327_v51 }
  0xc9   : > { %2525 = vmatmul.mubr.f32.gmra.mrb[12].mxu0 %v328_v52 }
  0xca   : > { %2527 = vmatprep.mubr.f32.mxu0 %v329_v53 }
  0xcd   : > { %2528 = vmatmul.mubr.f32.gmra.mrb[14].mxu0 %v330_v54 }
 0x112   : > { %v3226_v9 = vpop.permute.xlu1 %678 }
 0x113   : > { %v3230_v12 = vpop.permute.xlu0 %494 }
 0x117   : > { %v3228_v10 = vpop.permute.xlu1 %778 }
 0x118   : > { %v3242_v19 = vpop.permute.xlu0 %578 }
 0x11c   : > { %v3232_v13 = vpop.permute.xlu1 %878 }
 0x11d   : > { %v3274_v40 = vpop.permute.xlu0 %978 }
 0x121   : > { %v3246_v21 = vpop.permute.xlu1 %1078 }
 0x126   : > { %v3282_v46 = vpop.permute.xlu1 %1178 }
 0x184   : > { %v3248_v22 = vpop.f32.mrb[0].mxu0 }
 0x185   : > { %v413_v24 = vpop.f32.mrb[1].mxu0  ;;  %v504_v31 = vrot.slane %v3248_v22, %v3234_v15  ;;  %v588_v32 = vrot.slane %v3248_v22, %v3236_v16  ;;  %v688_v33 = vrot.slane %v3248_v22, %v3238_v17  ;;  %v788_v39 = vrot.slane %v3248_v22, %v3240_v18 }
 0x186   : > { %v500_v27 = vrot.slane %v413_v24, %v3234_v15  ;;  %v584_v28 = vrot.slane %v413_v24, %v3236_v16  ;;  %v684_v29 = vrot.slane %v413_v24, %v3238_v17  ;;  %v784_v30 = vrot.slane %v413_v24, %v3240_v18 }
 0x187   : > { %v884_v34 = vrot.slane %v413_v24, %v3244_v20  ;;  %v984_v38 = vrot.slane %v413_v24, %v3250_v23  ;;  %v1084_v44 = vrot.slane %v413_v24, %v3252_v25  ;;  %v1184_v45 = vrot.slane %v413_v24, %v3254_v26 }
 0x188   : > { %v3267_v35 = vpop.f32.mrb[2].mxu0  ;;  %v561_v36 = vmul.f32 %v500_v27, %v3230_v12  ;;  %v645_v37 = vmul.f32 %v584_v28, %v3242_v19  ;;  %v745_v42 = vmul.f32 %v684_v29, %v3226_v9  ;;  %v845_v43 = vmul.f32 %v784_v30, %v3228_v10 }
 0x189   : > { %v3276_v41 = vpop.f32.mrb[3].mxu0  ;;  %v512_v47 = vrot.slane %v3267_v35, %v3234_v15  ;;  %v596_v48 = vrot.slane %v3267_v35, %v3236_v16  ;;  %v696_v49 = vrot.slane %v3267_v35, %v3238_v17  ;;  %v945_v53 = vmul.f32 %v884_v34, %v3232_v13 }
 0x18a   : > { %v661_v50 = vadd.f32 %v645_v37, %v561_v36  ;;  %v508_v51 = vrot.slane %v3276_v41, %v3234_v15  ;;  %v592_v52 = vrot.slane %v3276_v41, %v3236_v16  ;;  %v562_v54 = vmul.f32 %v504_v31, %v3230_v12 }
 0x18b   : > { %v692_v55 = vrot.slane %v3276_v41, %v3238_v17  ;;  %v1045_v58 = vmul.f32 %v984_v38, %v3274_v40  ;;  %v646_v59 = vmul.f32 %v588_v32, %v3242_v19  ;;  %v1145_v61 = vmul.f32 %v1084_v44, %v3246_v21 }
 0x18c   : > { %v3298_v56 = vpop.f32.mrb[4].mxu0  ;;  %v761_v57 = vadd.f32 %v745_v42, %v661_v50  ;;  %v1245_v62 = vmul.f32 %v1184_v45, %v3282_v46  ;;  %v746_v63 = vmul.f32 %v688_v33, %v3226_v9  ;;  %v888_v0 = vrot.slane %v3248_v22, %v3244_v20 }
 0x18d   : > { %v3302_v60 = vpop.f32.mrb[5].mxu0  ;;  %v520_v1 = vrot.slane %v3298_v56, %v3234_v15  ;;  %v604_v2 = vrot.slane %v3298_v56, %v3236_v16  ;;  %v846_v4 = vmul.f32 %v788_v39, %v3228_v10  ;;  %v704_v5 = vrot.slane %v3298_v56, %v3238_v17 }
 0x18e   : > { %v861_v3 = vadd.f32 %v845_v43, %v761_v57  ;;  %v516_v6 = vrot.slane %v3302_v60, %v3234_v15  ;;  %v600_v7 = vrot.slane %v3302_v60, %v3236_v16  ;;  %v662_v8 = vadd.f32 %v646_v59, %v562_v54  ;;  %v3355_v54 = vld [vmem:[%s4283_s3] ss:$0 sm:$0xff] }
 0x18f   : > { %v988_v24 = vrot.slane %v3248_v22, %v3250_v23  ;;  %v563_v27 = vmul.f32 %v508_v51, %v3230_v12  ;;  %v647_v28 = vmul.f32 %v592_v52, %v3242_v19  ;;  %v700_v29 = vrot.slane %v3302_v60, %v3238_v17 }
 0x190   : > { %v3320_v11 = vpop.f32.mrb[6].mxu0  ;;  %v961_v14 = vadd.f32 %v945_v53, %v861_v3  ;;  %v762_v31 = vadd.f32 %v746_v63, %v662_v8  ;;  %v946_v32 = vmul.f32 %v888_v0, %v3232_v13  ;;  %v1088_v33 = vrot.slane %v3248_v22, %v3252_v25 }
 0x191   : > { %v3328_v30 = vpop.f32.mrb[7].mxu0  ;;  %v528_v34 = vrot.slane %v3320_v11, %v3234_v15  ;;  %v612_v36 = vrot.slane %v3320_v11, %v3236_v16  ;;  %v1188_v38 = vrot.slane %v3248_v22, %v3254_v26  ;;  %v712_v39 = vrot.slane %v3320_v11, %v3238_v17 }
 0x192   : > { %v1061_v37 = vadd.f32 %v1045_v58, %v961_v14  ;;  %v524_v42 = vrot.slane %v3328_v30, %v3234_v15  ;;  %v608_v43 = vrot.slane %v3328_v30, %v3236_v16  ;;  %v862_v44 = vadd.f32 %v846_v4, %v762_v31 }
 0x193   : > { %v708_v45 = vrot.slane %v3328_v30, %v3238_v17  ;;  %v1046_v52 = vmul.f32 %v988_v24, %v3274_v40  ;;  %v663_v53 = vadd.f32 %v647_v28, %v563_v27  ;;  %v1146_v58 = vmul.f32 %v1088_v33, %v3246_v21 }
 0x194   : > { %v3347_v50 = vpop.f32.mrb[8].mxu0  ;;  %v1161_v51 = vadd.f32 %v1145_v61, %v1061_v37  ;;  %v962_v57 = vadd.f32 %v946_v32, %v862_v44  ;;  %v747_v59 = vmul.f32 %v692_v55, %v3226_v9  ;;  %v792_v63 = vrot.slane %v3276_v41, %v3240_v18 }
 0x195   : > { %v3350_v22 = vpop.f32.mrb[9].mxu0  ;;  %v536_v61 = vrot.slane %v3347_v50, %v3234_v15  ;;  %v1246_v4 = vmul.f32 %v1188_v38, %v3282_v46  ;;  %v892_v32 = vrot.slane %v3276_v41, %v3244_v20  ;;  %v992_v44 = vrot.slane %v3276_v41, %v3250_v23 }
 0x196   : > { %v1261_v3 = vadd.f32 %v1245_v62, %v1161_v51  ;;  %v532_v14 = vrot.slane %v3350_v22, %v3234_v15  ;;  %v1062_v24 = vadd.f32 %v1046_v52, %v962_v57  ;;  %v763_v55 = vadd.f32 %v747_v59, %v663_v53 }
 0x197   : > { %v616_v27 = vrot.slane %v3350_v22, %v3236_v16  ;;  %v716_v28 = vrot.slane %v3350_v22, %v3238_v17  ;;  %v847_v38 = vmul.f32 %v792_v63, %v3228_v10  ;;  %v1092_v51 = vrot.slane %v3276_v41, %v3252_v25 }
 0x198   : > { %v3374_v31 = vpop.f32.mrb[10].mxu0  ;;  %v1284_v62 = vadd.f32 %v3355_v54, %v1261_v3  ;;  %v1162_v37 = vadd.f32 %v1146_v58, %v1062_v24  ;;  %v1192_v59 = vrot.slane %v3276_v41, %v3254_v26  ;;  %v947_v53 = vmul.f32 %v892_v32, %v3232_v13 }
 0x199   : > { %v3379_v33 = vpop.f32.mrb[11].mxu0  ;;  %v863_v24 = vadd.f32 %v847_v38, %v763_v55  ;;  %v564_v41 = vmul.f32 %v512_v47, %v3230_v12  ;;  %v1047_v38 = vmul.f32 %v992_v44, %v3274_v40  ;;  %v1147_v32 = vmul.f32 %v1092_v51, %v3246_v21 }
 0x19a   : > { %v1300_v57 = vmax.f32 %v1284_v62, 0.0  ;;  %v1262_v3 = vadd.f32 %v1246_v4, %v1162_v37  ;;  %v648_v62 = vmul.f32 %v596_v48, %v3242_v19  ;;  %v1247_v48 = vmul.f32 %v1192_v59, %v3282_v46 }
 0x19b   : > { %v963_v58 = vadd.f32 %v947_v53, %v863_v24  ;;  %v796_v44 = vrot.slane %v3267_v35, %v3240_v18  ;;  %v996_v51 = vrot.slane %v3267_v35, %v3250_v23  ;;  %v1000_v4 = vrot.slane %v3302_v60, %v3250_v23 }
 0x19c   : > { %v3398_v0 = vpop.f32.mrb[12].mxu0  ;;  %2562 = vmatprep.mubr.f32.mxu1 %v1300_v57  ;;  %v1285_v37 = vadd.f32 %v3355_v54, %v1262_v3  ;;  %v664_v8 = vadd.f32 %v648_v62, %v564_v41  ;;  %v748_v3 = vmul.f32 %v696_v49, %v3226_v9 }
 0x19d   : > { %v3411_v55 = vpop.f32.mrb[13].mxu0  ;;  %v1063_v24 = vadd.f32 %v1047_v38, %v963_v58  ;;  %v1096_v38 = vrot.slane %v3267_v35, %v3252_v25 }
 0x19e   : > { %v1301_v52 = vmax.f32 %v1285_v37, 0.0  ;;  %v764_v62 = vadd.f32 %v748_v3, %v664_v8  ;;  %v896_v37 = vrot.slane %v3267_v35, %v3244_v20  ;;  %v1196_v3 = vrot.slane %v3267_v35, %v3254_v26 }
 0x19f   : > { %v1163_v47 = vadd.f32 %v1147_v32, %v1063_v24  ;;  %v848_v32 = vmul.f32 %v796_v44, %v3228_v10  ;;  %v565_v44 = vmul.f32 %v516_v6, %v3230_v12  ;;  %v800_v35 = vrot.slane %v3302_v60, %v3240_v18 }
 0x1a0   : > { %v3433_v59 = vpop.f32.mrb[14].mxu0  ;;  %2563 = vmatmul.mubr.f32.vlgmr.msra.gmra.mrb[0].mxu1 %v1301_v52  ;;  %v948_v8 = vmul.f32 %v896_v37, %v3232_v13  ;;  %v1048_v37 = vmul.f32 %v996_v51, %v3274_v40  ;;  %v749_v6 = vmul.f32 %v700_v29, %v3226_v9  ;;  %v1248_v51 = vmul.f32 %v1196_v3, %v3282_v46 }
 0x1a1   : > { %v3437_v49 = vpop.f32.mrb[15].mxu0  ;;  %v1263_v24 = vadd.f32 %v1247_v48, %v1163_v47  ;;  %v864_v63 = vadd.f32 %v848_v32, %v764_v62  ;;  %v566_v29 = vmul.f32 %v520_v1, %v3230_v12  ;;  %v1049_v3 = vmul.f32 %v1000_v4, %v3274_v40 }
 0x1a2   : > { %v556_v53 = vrot.slane %v3437_v49, %v3234_v15  ;;  %v640_v58 = vrot.slane %v3437_v49, %v3236_v16  ;;  %v740_v41 = vrot.slane %v3437_v49, %v3238_v17  ;;  %v1004_v1 = vrot.slane %v3298_v56, %v3250_v23 }
 0x1a3   : > { %v1286_v47 = vadd.f32 %v3355_v54, %v1263_v24  ;;  %v964_v62 = vadd.f32 %v948_v8, %v864_v63  ;;  %v1148_v63 = vmul.f32 %v1096_v38, %v3246_v21  ;;  %v1100_v8 = vrot.slane %v3302_v60, %v3252_v25 }
 0x1a4   : > { %v3463_v52 = vmul.f32 %v556_v53, %v3230_v12  ;;  %v3470_v48 = vmul.f32 %v640_v58, %v3242_v19  ;;  %v649_v53 = vmul.f32 %v600_v7, %v3242_v19  ;;  %v900_v58 = vrot.slane %v3302_v60, %v3244_v20 }
 0x1a5   : > { %v1302_v32 = vmax.f32 %v1286_v47, 0.0  ;;  %v1064_v7 = vadd.f32 %v1048_v37, %v964_v62  ;;  %v849_v47 = vmul.f32 %v800_v35, %v3228_v10  ;;  %v650_v62 = vmul.f32 %v604_v2, %v3242_v19 }
 0x1a6   : > { %v665_v24 = vadd.f32 %v649_v53, %v565_v44  ;;  %v1200_v44 = vrot.slane %v3302_v60, %v3254_v26  ;;  %v949_v38 = vmul.f32 %v900_v58, %v3232_v13  ;;  %v804_v35 = vrot.slane %v3298_v56, %v3240_v18 }
 0x1a7   : > { %2565 = vmatprep.mubr.f32.mxu1 %v1302_v32  ;;  %v1164_v53 = vadd.f32 %v1148_v63, %v1064_v7  ;;  %v904_v60 = vrot.slane %v3298_v56, %v3244_v20  ;;  %v1149_v58 = vmul.f32 %v1100_v8, %v3246_v21  ;;  %v750_v4 = vmul.f32 %v704_v5, %v3226_v9 }
 0x1a8   : > { %v765_v57 = vadd.f32 %v749_v6, %v665_v24  ;;  %v666_v24 = vadd.f32 %v650_v62, %v566_v29  ;;  %v1104_v6 = vrot.slane %v3298_v56, %v3252_v25  ;;  %v1204_v7 = vrot.slane %v3298_v56, %v3254_v26 }
 0x1a9   : > { %v1264_v32 = vadd.f32 %v1248_v51, %v1164_v53  ;;  %v850_v8 = vmul.f32 %v804_v35, %v3228_v10  ;;  %v1050_v53 = vmul.f32 %v1004_v1, %v3274_v40  ;;  %v567_v5 = vmul.f32 %v524_v42, %v3230_v12 }
 0x1aa   : > { %v865_v37 = vadd.f32 %v849_v47, %v765_v57  ;;  %v1249_v57 = vmul.f32 %v1200_v44, %v3282_v46  ;;  %v766_v51 = vadd.f32 %v750_v4, %v666_v24  ;;  %v950_v47 = vmul.f32 %v904_v60, %v3232_v13 }
 0x1ab   : > { %v1287_v63 = vadd.f32 %v3355_v54, %v1264_v32  ;;  %v651_v56 = vmul.f32 %v608_v43, %v3242_v19  ;;  %v808_v62 = vrot.slane %v3328_v30, %v3240_v18  ;;  %v751_v42 = vmul.f32 %v708_v45, %v3226_v9 }
 0x1ac   : > { %v965_v2 = vadd.f32 %v949_v38, %v865_v37  ;;  %v866_v38 = vadd.f32 %v850_v8, %v766_v51  ;;  %v1008_v60 = vrot.slane %v3328_v30, %v3250_v23  ;;  %v1150_v1 = vmul.f32 %v1104_v6, %v3246_v21 }
 0x1ad   : > { %v1303_v44 = vmax.f32 %v1287_v63, 0.0  ;;  %v667_v35 = vadd.f32 %v651_v56, %v567_v5  ;;  %v1250_v32 = vmul.f32 %v1204_v7, %v3282_v46  ;;  %v1108_v24 = vrot.slane %v3328_v30, %v3252_v25 }
 0x1ae   : > { %v1065_v29 = vadd.f32 %v1049_v3, %v965_v2  ;;  %v908_v3 = vrot.slane %v3328_v30, %v3244_v20  ;;  %v966_v43 = vadd.f32 %v950_v47, %v866_v38  ;;  %v851_v2 = vmul.f32 %v808_v62, %v3228_v10 }
 0x1af   : > { %2566 = vmatmul.mubr.f32.gmra.mrb[2].mxu1 %v1303_v44  ;;  %v1208_v45 = vrot.slane %v3328_v30, %v3254_v26  ;;  %v568_v6 = vmul.f32 %v528_v34, %v3230_v12  ;;  %v652_v7 = vmul.f32 %v612_v36, %v3242_v19  ;;  %v1051_v47 = vmul.f32 %v1008_v60, %v3274_v40 }
 0x1b0   : > { %v1165_v37 = vadd.f32 %v1149_v58, %v1065_v29  ;;  %v767_v58 = vadd.f32 %v751_v42, %v667_v35  ;;  %v951_v63 = vmul.f32 %v908_v3, %v3232_v13  ;;  %v1066_v51 = vadd.f32 %v1050_v53, %v966_v43 }
 0x1b1   : > { %v812_v29 = vrot.slane %v3320_v11, %v3240_v18  ;;  %v668_v30 = vadd.f32 %v652_v7, %v568_v6  ;;  %v752_v34 = vmul.f32 %v712_v39, %v3226_v9  ;;  %v912_v5 = vrot.slane %v3320_v11, %v3244_v20 }
 0x1b2   : > { %v1265_v4 = vadd.f32 %v1249_v57, %v1165_v37  ;;  %v867_v8 = vadd.f32 %v851_v2, %v767_v58  ;;  %v1166_v53 = vadd.f32 %v1150_v1, %v1066_v51  ;;  %v1151_v44 = vmul.f32 %v1108_v24, %v3246_v21 }
 0x1b3   : > { %v1012_v38 = vrot.slane %v3320_v11, %v3250_v23  ;;  %v1251_v3 = vmul.f32 %v1208_v45, %v3282_v46  ;;  %v768_v37 = vadd.f32 %v752_v34, %v668_v30  ;;  %v852_v35 = vmul.f32 %v812_v29, %v3228_v10 }
 0x1b4   : > { %v1288_v57 = vadd.f32 %v3355_v54, %v1265_v4  ;;  %v967_v36 = vadd.f32 %v951_v63, %v867_v8  ;;  %v1266_v62 = vadd.f32 %v1250_v32, %v1166_v53  ;;  %v1112_v39 = vrot.slane %v3320_v11, %v3252_v25 }
 0x1b5   : > { %v1212_v60 = vrot.slane %v3320_v11, %v3254_v26  ;;  %v569_v43 = vmul.f32 %v532_v14, %v3230_v12  ;;  %v868_v32 = vadd.f32 %v852_v35, %v768_v37  ;;  %v952_v24 = vmul.f32 %v912_v5, %v3232_v13 }
 0x1b6   : > { %v1304_v56 = vmax.f32 %v1288_v57, 0.0  ;;  %v1067_v42 = vadd.f32 %v1051_v47, %v967_v36  ;;  %v1289_v1 = vadd.f32 %v3355_v54, %v1266_v62  ;;  %v653_v4 = vmul.f32 %v616_v27, %v3242_v19 }
 0x1b7   : > { %v1052_v2 = vmul.f32 %v1012_v38, %v3274_v40  ;;  %v753_v11 = vmul.f32 %v716_v28, %v3226_v9  ;;  %v816_v14 = vrot.slane %v3350_v22, %v3240_v18  ;;  %v968_v51 = vadd.f32 %v952_v24, %v868_v32 }
 0x1b8   : > { %2568 = vmatprep.mubr.f32.mxu1 %v1304_v56  ;;  %v1167_v58 = vadd.f32 %v1151_v44, %v1067_v42  ;;  %v1305_v63 = vmax.f32 %v1289_v1, 0.0  ;;  %v669_v45 = vadd.f32 %v653_v4, %v569_v43  ;;  %v916_v6 = vrot.slane %v3350_v22, %v3244_v20 }
 0x1b9   : > { %v1152_v27 = vmul.f32 %v1112_v39, %v3246_v21  ;;  %v1252_v57 = vmul.f32 %v1212_v60, %v3282_v46  ;;  %v1016_v8 = vrot.slane %v3350_v22, %v3250_v23  ;;  %v1068_v47 = vadd.f32 %v1052_v2, %v968_v51 }
 0x1ba   : > { %v1267_v7 = vadd.f32 %v1251_v3, %v1167_v58  ;;  %2569 = vmatmul.mubr.f32.gmra.mrb[4].mxu1 %v1305_v63  ;;  %v769_v28 = vadd.f32 %v753_v11, %v669_v45  ;;  %v853_v29 = vmul.f32 %v816_v14, %v3228_v10  ;;  %v1116_v53 = vrot.slane %v3350_v22, %v3252_v25 }
 0x1bb   : > { %v1216_v34 = vrot.slane %v3350_v22, %v3254_v26  ;;  %v570_v5 = vmul.f32 %v536_v61, %v3230_v12  ;;  %v4321_v56 = vrot.slane %v3347_v50, %v3236_v16  ;;  %v1168_v44 = vadd.f32 %v1152_v27, %v1068_v47 }
 0x1bc   : > { %v1290_v30 = vadd.f32 %v3355_v54, %v1267_v7  ;;  %v869_v38 = vadd.f32 %v853_v29, %v769_v28  ;;  %v953_v62 = vmul.f32 %v916_v6, %v3232_v13  ;;  %v4322_v3 = vrot.slane %v3347_v50, %v3238_v17 }
 0x1bd   : > { %v654_v36 = vmul.f32 %v4321_v56, %v3242_v19  ;;  %v820_v42 = vrot.slane %v3347_v50, %v3240_v18  ;;  %v920_v61 = vrot.slane %v3347_v50, %v3244_v20  ;;  %v1268_v39 = vadd.f32 %v1252_v57, %v1168_v44 }
 0x1be   : > { %v754_v37 = vmul.f32 %v4322_v3, %v3226_v9  ;;  %v1306_v22 = vmax.f32 %v1290_v30, 0.0  ;;  %v969_v60 = vadd.f32 %v953_v62, %v869_v38  ;;  %v1053_v43 = vmul.f32 %v1016_v8, %v3274_v40 }
 0x1bf   : > { %v670_v35 = vadd.f32 %v654_v36, %v570_v5  ;;  %v1020_v1 = vrot.slane %v3347_v50, %v3250_v23  ;;  %v1153_v32 = vmul.f32 %v1116_v53, %v3246_v21  ;;  %v1253_v24 = vmul.f32 %v1216_v34, %v3282_v46 }
 0x1c0   : > { %2571 = vmatprep.mubr.f32.mxu1 %v1306_v22  ;;  %v854_v58 = vmul.f32 %v820_v42, %v3228_v10  ;;  %v1291_v2 = vadd.f32 %v3355_v54, %v1268_v39  ;;  %v1069_v11 = vadd.f32 %v1053_v43, %v969_v60  ;;  %v954_v14 = vmul.f32 %v920_v61, %v3232_v13 }
 0x1c1   : > { %v770_v4 = vadd.f32 %v754_v37, %v670_v35  ;;  %v1120_v63 = vrot.slane %v3347_v50, %v3252_v25  ;;  %v1220_v45 = vrot.slane %v3347_v50, %v3254_v26  ;;  %v4323_v6 = vrot.slane %v3379_v33, %v3234_v15 }
 0x1c2   : > { %v4324_v27 = vrot.slane %v3379_v33, %v3236_v16  ;;  %v1307_v8 = vmax.f32 %v1291_v2, 0.0  ;;  %v1169_v47 = vadd.f32 %v1153_v32, %v1069_v11  ;;  %v1054_v28 = vmul.f32 %v1020_v1, %v3274_v40 }
 0x1c3   : > { %v870_v51 = vadd.f32 %v854_v58, %v770_v4  ;;  %v571_v7 = vmul.f32 %v4323_v6, %v3230_v12  ;;  %v824_v29 = vrot.slane %v3379_v33, %v3240_v18  ;;  %v4325_v50 = vrot.slane %v3379_v33, %v3238_v17 }
 0x1c4   : > { %v655_v57 = vmul.f32 %v4324_v27, %v3242_v19  ;;  %v924_v5 = vrot.slane %v3379_v33, %v3244_v20  ;;  %v3660_v56 = vmul.f32 %v740_v41, %v3226_v9  ;;  %2572 = vmatmul.mubr.f32.gmra.mrb[6].mxu1 %v1307_v8  ;;  %v1269_v36 = vadd.f32 %v1253_v24, %v1169_v47 }
 0x1c5   : > { %v970_v53 = vadd.f32 %v954_v14, %v870_v51  ;;  %v755_v34 = vmul.f32 %v4325_v50, %v3226_v9  ;;  %v1154_v44 = vmul.f32 %v1120_v63, %v3246_v21  ;;  %v1024_v38 = vrot.slane %v3379_v33, %v3250_v23 }
 0x1c6   : > { %v671_v30 = vadd.f32 %v655_v57, %v571_v7  ;;  %v1254_v3 = vmul.f32 %v1220_v45, %v3282_v46  ;;  %v855_v22 = vmul.f32 %v824_v29, %v3228_v10  ;;  %v1292_v35 = vadd.f32 %v3355_v54, %v1269_v36 }
 0x1c7   : > { %v1070_v62 = vadd.f32 %v1054_v28, %v970_v53  ;;  %v1124_v42 = vrot.slane %v3379_v33, %v3252_v25  ;;  %v1224_v41 = vrot.slane %v3379_v33, %v3254_v26  ;;  %v4326_v61 = vrot.slane %v3374_v31, %v3234_v15 }
 0x1c8   : > { %v771_v37 = vadd.f32 %v755_v34, %v671_v30  ;;  %v955_v1 = vmul.f32 %v924_v5, %v3232_v13  ;;  %v4327_v32 = vrot.slane %v3374_v31, %v3236_v16  ;;  %v1308_v4 = vmax.f32 %v1292_v35, 0.0 }
 0x1c9   : > { %v572_v39 = vmul.f32 %v4326_v61, %v3230_v12  ;;  %v1170_v60 = vadd.f32 %v1154_v44, %v1070_v62  ;;  %v1055_v58 = vmul.f32 %v1024_v38, %v3274_v40  ;;  %v828_v33 = vrot.slane %v3374_v31, %v3240_v18 }
 0x1ca   : > { %v871_v43 = vadd.f32 %v855_v22, %v771_v37  ;;  %v656_v24 = vmul.f32 %v4327_v32, %v3242_v19  ;;  %v928_v2 = vrot.slane %v3374_v31, %v3244_v20  ;;  %v4328_v51 = vrot.slane %v3374_v31, %v3238_v17  ;;  %2574 = vmatprep.mubr.f32.mxu1 %v1308_v4 }
 0x1cb   : > { %v1270_v11 = vadd.f32 %v1254_v3, %v1170_v60  ;;  %v1155_v6 = vmul.f32 %v1124_v42, %v3246_v21  ;;  %v856_v7 = vmul.f32 %v828_v33, %v3228_v10  ;;  %v1028_v27 = vrot.slane %v3374_v31, %v3250_v23 }
 0x1cc   : > { %v971_v14 = vadd.f32 %v955_v1, %v871_v43  ;;  %v672_v63 = vadd.f32 %v656_v24, %v572_v39  ;;  %v756_v45 = vmul.f32 %v4328_v51, %v3226_v9  ;;  %v1128_v57 = vrot.slane %v3374_v31, %v3252_v25 }
 0x1cd   : > { %v1293_v8 = vadd.f32 %v3355_v54, %v1270_v11  ;;  %v1228_v29 = vrot.slane %v3374_v31, %v3254_v26  ;;  %v1255_v53 = vmul.f32 %v1224_v41, %v3282_v46  ;;  %v956_v30 = vmul.f32 %v928_v2, %v3232_v13 }
 0x1ce   : > { %v1071_v47 = vadd.f32 %v1055_v58, %v971_v14  ;;  %v772_v28 = vadd.f32 %v756_v45, %v672_v63  ;;  %v4329_v50 = vrot.slane %v3411_v55, %v3234_v15  ;;  %v4330_v5 = vrot.slane %v3411_v55, %v3236_v16 }
 0x1cf   : > { %v1309_v44 = vmax.f32 %v1293_v8, 0.0  ;;  %v832_v31 = vrot.slane %v3411_v55, %v3240_v18  ;;  %v1056_v3 = vmul.f32 %v1028_v27, %v3274_v40  ;;  %v4331_v22 = vrot.slane %v3411_v55, %v3238_v17 }
 0x1d0   : > { %v573_v34 = vmul.f32 %v4329_v50, %v3230_v12  ;;  %v657_v36 = vmul.f32 %v4330_v5, %v3242_v19  ;;  %v1171_v38 = vadd.f32 %v1155_v6, %v1071_v47  ;;  %v872_v62 = vadd.f32 %v856_v7, %v772_v28 }
 0x1d1   : > { %v757_v35 = vmul.f32 %v4331_v22, %v3226_v9  ;;  %v932_v42 = vrot.slane %v3411_v55, %v3244_v20  ;;  %2575 = vmatmul.mubr.f32.gmra.mrb[8].mxu1 %v1309_v44  ;;  %v1156_v39 = vmul.f32 %v1128_v57, %v3246_v21  ;;  %v1256_v60 = vmul.f32 %v1228_v29, %v3282_v46 }
 0x1d2   : > { %v673_v37 = vadd.f32 %v657_v36, %v573_v34  ;;  %v1271_v41 = vadd.f32 %v1255_v53, %v1171_v38  ;;  %v972_v61 = vadd.f32 %v956_v30, %v872_v62  ;;  %v857_v1 = vmul.f32 %v832_v31, %v3228_v10 }
 0x1d3   : > { %v1032_v32 = vrot.slane %v3411_v55, %v3250_v23  ;;  %v1132_v24 = vrot.slane %v3411_v55, %v3252_v25  ;;  %v1232_v33 = vrot.slane %v3411_v55, %v3254_v26  ;;  %v4332_v2 = vrot.slane %v3398_v0, %v3234_v15 }
 0x1d4   : > { %v773_v43 = vadd.f32 %v757_v35, %v673_v37  ;;  %v1294_v4 = vadd.f32 %v3355_v54, %v1271_v41  ;;  %v1072_v58 = vadd.f32 %v1056_v3, %v972_v61  ;;  %v957_v63 = vmul.f32 %v932_v42, %v3232_v13 }
 0x1d5   : > { %v574_v11 = vmul.f32 %v4332_v2, %v3230_v12  ;;  %v4333_v51 = vrot.slane %v3398_v0, %v3236_v16  ;;  %v836_v6 = vrot.slane %v3398_v0, %v3240_v18  ;;  %v936_v55 = vrot.slane %v3398_v0, %v3244_v20 }
 0x1d6   : > { %v873_v14 = vadd.f32 %v857_v1, %v773_v43  ;;  %v1310_v7 = vmax.f32 %v1294_v4, 0.0  ;;  %v1172_v27 = vadd.f32 %v1156_v39, %v1072_v58  ;;  %v1036_v57 = vrot.slane %v3398_v0, %v3250_v23 }
 0x1d7   : > { %v658_v45 = vmul.f32 %v4333_v51, %v3242_v19  ;;  %v1057_v47 = vmul.f32 %v1032_v32, %v3274_v40  ;;  %v4334_v29 = vrot.slane %v3398_v0, %v3238_v17  ;;  %v1157_v50 = vmul.f32 %v1132_v24, %v3246_v21 }
 0x1d8   : > { %v973_v8 = vadd.f32 %v957_v63, %v873_v14  ;;  %2577 = vmatprep.mubr.f32.mxu1 %v1310_v7  ;;  %v1272_v30 = vadd.f32 %v1256_v60, %v1172_v27  ;;  %v1257_v34 = vmul.f32 %v1232_v33, %v3282_v46  ;;  %v858_v5 = vmul.f32 %v836_v6, %v3228_v10 }
 0x1d9   : > { %v674_v28 = vadd.f32 %v658_v45, %v574_v11  ;;  %v758_v53 = vmul.f32 %v4334_v29, %v3226_v9  ;;  %v1136_v38 = vrot.slane %v3398_v0, %v3252_v25  ;;  %v675_v62 = vadd.f32 %v3470_v48, %v3463_v52 }
 0x1da   : > { %v1073_v36 = vadd.f32 %v1057_v47, %v973_v8  ;;  %v1295_v31 = vadd.f32 %v3355_v54, %v1272_v30  ;;  %v958_v3 = vmul.f32 %v936_v55, %v3232_v13  ;;  %v1058_v37 = vmul.f32 %v1036_v57, %v3274_v40 }
 0x1db   : > { %v774_v44 = vadd.f32 %v758_v53, %v674_v28  ;;  %v4335_v22 = vrot.slane %v3437_v49, %v3240_v18  ;;  %v775_v61 = vadd.f32 %v3660_v56, %v675_v62  ;;  %v1040_v39 = vrot.slane %v3437_v49, %v3250_v23 }
 0x1dc   : > { %v1173_v42 = vadd.f32 %v1157_v50, %v1073_v36  ;;  %v1311_v60 = vmax.f32 %v1295_v31, 0.0  ;;  %v1236_v52 = vrot.slane %v3398_v0, %v3254_v26  ;;  %v4336_v48 = vrot.slane %v3437_v49, %v3244_v20 }
 0x1dd   : > { %v859_v35 = vmul.f32 %v4335_v22, %v3228_v10  ;;  %v874_v41 = vadd.f32 %v858_v5, %v774_v44  ;;  %v4337_v1 = vrot.slane %v3433_v59, %v3234_v15  ;;  %v1140_v58 = vrot.slane %v3437_v49, %v3252_v25 }
 0x1de   : > { %v959_v43 = vmul.f32 %v4336_v48, %v3232_v13  ;;  %v1273_v24 = vadd.f32 %v1257_v34, %v1173_v42  ;;  %2578 = vmatmul.mubr.f32.gmra.mrb[10].mxu1 %v1311_v60  ;;  %v1158_v33 = vmul.f32 %v1136_v38, %v3246_v21  ;;  %v1059_v0 = vmul.f32 %v1040_v39, %v3274_v40 }
 0x1df   : > { %v576_v32 = vmul.f32 %v4337_v1, %v3230_v12  ;;  %v974_v4 = vadd.f32 %v958_v3, %v874_v41  ;;  %v875_v56 = vadd.f32 %v859_v35, %v775_v61  ;;  %v1240_v2 = vrot.slane %v3437_v49, %v3254_v26 }
 0x1e0   : > { %v4338_v11 = vrot.slane %v3433_v59, %v3236_v16  ;;  %v1296_v63 = vadd.f32 %v3355_v54, %v1273_v24  ;;  %v844_v6 = vrot.slane %v3433_v59, %v3240_v18  ;;  %v1258_v7 = vmul.f32 %v1236_v52, %v3282_v46 }
 0x1e1   : > { %v1074_v51 = vadd.f32 %v1058_v37, %v974_v4  ;;  %v975_v45 = vadd.f32 %v959_v43, %v875_v56  ;;  %v4339_v55 = vrot.slane %v3433_v59, %v3238_v17  ;;  %v944_v57 = vrot.slane %v3433_v59, %v3244_v20 }
 0x1e2   : > { %v660_v14 = vmul.f32 %v4338_v11, %v3242_v19  ;;  %v1312_v8 = vmax.f32 %v1296_v63, 0.0  ;;  %v1159_v29 = vmul.f32 %v1140_v58, %v3246_v21  ;;  %v860_v30 = vmul.f32 %v844_v6, %v3228_v10 }
 0x1e3   : > { %v760_v49 = vmul.f32 %v4339_v55, %v3226_v9  ;;  %v1174_v47 = vadd.f32 %v1158_v33, %v1074_v51  ;;  %v1075_v28 = vadd.f32 %v1059_v0, %v975_v45  ;;  %v1044_v50 = vrot.slane %v3433_v59, %v3250_v23 }
 0x1e4   : > { %v676_v27 = vadd.f32 %v660_v14, %v576_v32  ;;  %2580 = vmatprep.mubr.f32.mxu1 %v1312_v8  ;;  %v1259_v36 = vmul.f32 %v1240_v2, %v3282_v46  ;;  %v960_v38 = vmul.f32 %v944_v57, %v3232_v13  ;;  %v1144_v62 = vrot.slane %v3433_v59, %v3252_v25 }
 0x1e5   : > { %v1274_v34 = vadd.f32 %v1258_v7, %v1174_v47  ;;  %v1175_v5 = vadd.f32 %v1159_v29, %v1075_v28  ;;  %v1060_v22 = vmul.f32 %v1044_v50, %v3274_v40  ;;  %v1244_v35 = vrot.slane %v3433_v59, %v3254_v26 }
 0x1e6   : > { %v776_v53 = vadd.f32 %v760_v49, %v676_v27  ;;  %v1160_v39 = vmul.f32 %v1144_v62, %v3246_v21 }
 0x1e7   : > { %v1297_v31 = vadd.f32 %v3355_v54, %v1274_v34  ;;  %v1275_v3 = vadd.f32 %v1259_v36, %v1175_v5  ;;  %v1260_v48 = vmul.f32 %v1244_v35, %v3282_v46 }
 0x1e8   : > { %v876_v44 = vadd.f32 %v860_v30, %v776_v53 }
 0x1e9   : > { %v1313_v42 = vmax.f32 %v1297_v31, 0.0  ;;  %v1298_v41 = vadd.f32 %v3355_v54, %v1275_v3 }
 0x1ea   : > { %v976_v37 = vadd.f32 %v960_v38, %v876_v44 }
 0x1eb   : > { %2581 = vmatmul.mubr.f32.gmra.mrb[12].mxu1 %v1313_v42  ;;  %v1314_v60 = vmax.f32 %v1298_v41, 0.0 }
 0x1ec   : > { %v1076_v61 = vadd.f32 %v1060_v22, %v976_v37 }
 0x1ed   : > { %2583 = vmatprep.mubr.f32.mxu1 %v1314_v60  ;;  %v3844_v60 = vld [vmem:[%s4285_s5] ss:$0 sm:$0xff] }
 0x1ee   : > { %v1176_v52 = vadd.f32 %v1160_v39, %v1076_v61 }
 0x1f0   : > { %v1276_v43 = vadd.f32 %v1260_v48, %v1176_v52 }
 0x1f2   : > { %v1299_v1 = vadd.f32 %v3355_v54, %v1276_v43 }
 0x1f4   : > { %v1315_v32 = vmax.f32 %v1299_v1, 0.0 }
 0x1f6   : > { %2584 = vmatmul.mubr.f32.gmra.mrb[14].mxu1 %v1315_v32 }
 0x273   : > { %v2564_v24 = vpop.f32.mrb[0].mxu1 }
 0x274   : > { %v1484_v59 = vrot.slane %v2564_v24, %v3234_v15  ;;  %v1564_v4 = vrot.slane %v2564_v24, %v3236_v16  ;;  %v1660_v56 = vrot.slane %v2564_v24, %v3238_v17  ;;  %v1398_v58 = vpop.f32.mrb[1].mxu1  ;;  %v1756_v33 = vrot.slane %v2564_v24, %v3240_v18 }
 0x275   : > { %v1852_v54 = vrot.slane %v2564_v24, %v3244_v20  ;;  %v1480_v63 = vrot.slane %v1398_v58, %v3234_v15  ;;  %v1560_v51 = vrot.slane %v1398_v58, %v3236_v16  ;;  %v1656_v45 = vrot.slane %v1398_v58, %v3238_v17 }
 0x276   : > { %v1542_v0 = vmul.f32 %v1484_v59, %v3230_v12  ;;  %v1622_v2 = vmul.f32 %v1564_v4, %v3242_v19  ;;  %v1718_v11 = vmul.f32 %v1660_v56, %v3226_v9  ;;  %v1814_v6 = vmul.f32 %v1756_v33, %v3228_v10 }
 0x277   : > { %v1948_v7 = vrot.slane %v2564_v24, %v3250_v23  ;;  %v1541_v55 = vmul.f32 %v1480_v63, %v3230_v12  ;;  %v1621_v49 = vmul.f32 %v1560_v51, %v3242_v19  ;;  %v1752_v57 = vrot.slane %v1398_v58, %v3240_v18 }
 0x278   : > { %v1638_v14 = vadd.f32 %v1622_v2, %v1542_v0  ;;  %v1910_v8 = vmul.f32 %v1852_v54, %v3232_v13  ;;  %v2044_v47 = vrot.slane %v2564_v24, %v3252_v25  ;;  %v1717_v53 = vmul.f32 %v1656_v45, %v3226_v9 }
 0x279   : > { %v1637_v29 = vadd.f32 %v1621_v49, %v1541_v55  ;;  %v1848_v30 = vrot.slane %v1398_v58, %v3244_v20  ;;  %v2006_v50 = vmul.f32 %v1948_v7, %v3274_v40  ;;  %v2140_v34 = vrot.slane %v2564_v24, %v3254_v26 }
 0x27a   : > { %v1734_v27 = vadd.f32 %v1718_v11, %v1638_v14  ;;  %v1813_v44 = vmul.f32 %v1752_v57, %v3228_v10  ;;  %v1944_v38 = vrot.slane %v1398_v58, %v3250_v23  ;;  %v2102_v62 = vmul.f32 %v2044_v47, %v3246_v21 }
 0x27b   : > { %v1733_v36 = vadd.f32 %v1717_v53, %v1637_v29  ;;  %v1909_v37 = vmul.f32 %v1848_v30, %v3232_v13  ;;  %v2040_v22 = vrot.slane %v1398_v58, %v3252_v25  ;;  %v2136_v35 = vrot.slane %v1398_v58, %v3254_v26 }
 0x27c   : > { %v1830_v28 = vadd.f32 %v1814_v6, %v1734_v27  ;;  %v2198_v41 = vmul.f32 %v2140_v34, %v3282_v46  ;;  %v2005_v39 = vmul.f32 %v1944_v38, %v3274_v40 }
 0x27d   : > { %v1829_v3 = vadd.f32 %v1813_v44, %v1733_v36  ;;  %v2101_v43 = vmul.f32 %v2040_v22, %v3246_v21  ;;  %v2197_v1 = vmul.f32 %v2136_v35, %v3282_v46 }
 0x27e   : > { %v1926_v5 = vadd.f32 %v1910_v8, %v1830_v28 }
 0x27f   : > { %v1925_v61 = vadd.f32 %v1909_v37, %v1829_v3 }
 0x280   : > { %v2022_v31 = vadd.f32 %v2006_v50, %v1926_v5 }
 0x281   : > { %v2021_v48 = vadd.f32 %v2005_v39, %v1925_v61 }
 0x282   : > { %v2118_v42 = vadd.f32 %v2102_v62, %v2022_v31  ;;  %v2567_v32 = vpop.f32.mrb[2].mxu1 }
 0x283   : > { %v2117_v59 = vadd.f32 %v2101_v43, %v2021_v48  ;;  %v1492_v4 = vrot.slane %v2567_v32, %v3234_v15  ;;  %v1572_v56 = vrot.slane %v2567_v32, %v3236_v16  ;;  %v3851_v58 = vpop.f32.mrb[3].mxu1  ;;  %v1668_v33 = vrot.slane %v2567_v32, %v3238_v17 }
 0x284   : > { %v2214_v52 = vadd.f32 %v2198_v41, %v2118_v42  ;;  %v1764_v54 = vrot.slane %v2567_v32, %v3240_v18  ;;  %v1860_v45 = vrot.slane %v2567_v32, %v3244_v20  ;;  %v1488_v6 = vrot.slane %v3851_v58, %v3234_v15 }
 0x285   : > { %v2213_v0 = vadd.f32 %v2197_v1, %v2117_v59  ;;  %v1544_v2 = vmul.f32 %v1492_v4, %v3230_v12  ;;  %v1624_v11 = vmul.f32 %v1572_v56, %v3242_v19  ;;  %v1720_v51 = vmul.f32 %v1668_v33, %v3226_v9 }
 0x286   : > { %v2237_v24 = vadd.f32 %v3844_v60, %v2214_v52  ;;  %v1568_v7 = vrot.slane %v3851_v58, %v3236_v16  ;;  %v1664_v27 = vrot.slane %v3851_v58, %v3238_v17  ;;  %v1816_v49 = vmul.f32 %v1764_v54, %v3228_v10 }
 0x287   : > { %v2236_v14 = vadd.f32 %v3844_v60, %v2213_v0  ;;  %v1640_v63 = vadd.f32 %v1624_v11, %v1544_v2  ;;  %v1956_v57 = vrot.slane %v2567_v32, %v3250_v23  ;;  %v2052_v8 = vrot.slane %v2567_v32, %v3252_v25 }
 0x288   : > { %2253 = vst [vmem:[%s3855_s18 + $0x8] sm:$0xff] %v2237_v24  ;;  %v1543_v47 = vmul.f32 %v1488_v6, %v3230_v12  ;;  %v1623_v28 = vmul.f32 %v1568_v7, %v3242_v19  ;;  %v1760_v29 = vrot.slane %v3851_v58, %v3240_v18  ;;  %v1912_v30 = vmul.f32 %v1860_v45, %v3232_v13 }
 0x289   : > { %2252 = vst [vmem:[%s3855_s18] sm:$0xff] %v2236_v14  ;;  %v1736_v55 = vadd.f32 %v1720_v51, %v1640_v63  ;;  %v2148_v50 = vrot.slane %v2567_v32, %v3254_v26  ;;  %v1719_v5 = vmul.f32 %v1664_v27, %v3226_v9  ;;  %v1856_v36 = vrot.slane %v3851_v58, %v3244_v20 }
 0x28a   : > { %v1639_v34 = vadd.f32 %v1623_v28, %v1543_v47  ;;  %v1952_v44 = vrot.slane %v3851_v58, %v3250_v23  ;;  %v2008_v62 = vmul.f32 %v1956_v57, %v3274_v40  ;;  %v2104_v31 = vmul.f32 %v2052_v8, %v3246_v21 }
 0x28b   : > { %v1832_v53 = vadd.f32 %v1816_v49, %v1736_v55  ;;  %v1815_v37 = vmul.f32 %v1760_v29, %v3228_v10  ;;  %v2048_v22 = vrot.slane %v3851_v58, %v3252_v25  ;;  %v2200_v48 = vmul.f32 %v2148_v50, %v3282_v46 }
 0x28c   : > { %v1735_v3 = vadd.f32 %v1719_v5, %v1639_v34  ;;  %v1911_v1 = vmul.f32 %v1856_v36, %v3232_v13  ;;  %v2007_v32 = vmul.f32 %v1952_v44, %v3274_v40  ;;  %v2144_v2 = vrot.slane %v3851_v58, %v3254_v26 }
 0x28d   : > { %v1928_v38 = vadd.f32 %v1912_v30, %v1832_v53  ;;  %v2570_v35 = vpop.f32.mrb[4].mxu1  ;;  %v2103_v0 = vmul.f32 %v2048_v22, %v3246_v21 }
 0x28e   : > { %v1500_v41 = vrot.slane %v2570_v35, %v3234_v15  ;;  %v1580_v61 = vrot.slane %v2570_v35, %v3236_v16  ;;  %v1676_v39 = vrot.slane %v2570_v35, %v3238_v17  ;;  %v3893_v52 = vpop.f32.mrb[5].mxu1  ;;  %v1831_v43 = vadd.f32 %v1815_v37, %v1735_v3 }
 0x28f   : > { %v2024_v42 = vadd.f32 %v2008_v62, %v1928_v38  ;;  %v1772_v56 = vrot.slane %v2570_v35, %v3240_v18  ;;  %v1868_v11 = vrot.slane %v2570_v35, %v3244_v20  ;;  %v1964_v51 = vrot.slane %v2570_v35, %v3250_v23 }
 0x290   : > { %v1546_v59 = vmul.f32 %v1500_v41, %v3230_v12  ;;  %v1626_v4 = vmul.f32 %v1580_v61, %v3242_v19  ;;  %v1927_v33 = vadd.f32 %v1911_v1, %v1831_v43  ;;  %v1722_v63 = vmul.f32 %v1676_v39, %v3226_v9 }
 0x291   : > { %v2120_v24 = vadd.f32 %v2104_v31, %v2024_v42  ;;  %v1496_v6 = vrot.slane %v3893_v52, %v3234_v15  ;;  %v1576_v7 = vrot.slane %v3893_v52, %v3236_v16  ;;  %v1672_v27 = vrot.slane %v3893_v52, %v3238_v17 }
 0x292   : > { %v1642_v14 = vadd.f32 %v1626_v4, %v1546_v59  ;;  %v2023_v45 = vadd.f32 %v2007_v32, %v1927_v33  ;;  %v1818_v49 = vmul.f32 %v1772_v56, %v3228_v10  ;;  %v2060_v57 = vrot.slane %v2570_v35, %v3252_v25 }
 0x293   : > { %v2216_v54 = vadd.f32 %v2200_v48, %v2120_v24  ;;  %v2199_v47 = vmul.f32 %v2144_v2, %v3282_v46  ;;  %v1545_v28 = vmul.f32 %v1496_v6, %v3230_v12  ;;  %v1625_v29 = vmul.f32 %v1576_v7, %v3242_v19 }
 0x294   : > { %v1738_v55 = vadd.f32 %v1722_v63, %v1642_v14  ;;  %v2119_v8 = vadd.f32 %v2103_v0, %v2023_v45  ;;  %v1914_v30 = vmul.f32 %v1868_v11, %v3232_v13  ;;  %v2156_v50 = vrot.slane %v2570_v35, %v3254_v26 }
 0x295   : > { %v2239_v58 = vadd.f32 %v3844_v60, %v2216_v54  ;;  %v1768_v34 = vrot.slane %v3893_v52, %v3240_v18  ;;  %v1641_v36 = vadd.f32 %v1625_v29, %v1545_v28  ;;  %v1721_v44 = vmul.f32 %v1672_v27, %v3226_v9 }
 0x296   : > { %v1834_v53 = vadd.f32 %v1818_v49, %v1738_v55  ;;  %v2215_v5 = vadd.f32 %v2199_v47, %v2119_v8  ;;  %v1864_v38 = vrot.slane %v3893_v52, %v3244_v20  ;;  %v2010_v3 = vmul.f32 %v1964_v51, %v3274_v40 }
 0x297   : > { %2255 = vst [vmem:[%s3855_s18 + $0x18] sm:$0xff] %v2239_v58  ;;  %v3927_v62 = vpop.f32.mrb[6].mxu1  ;;  %v2106_v37 = vmul.f32 %v2060_v57, %v3246_v21  ;;  %v1960_v22 = vrot.slane %v3893_v52, %v3250_v23  ;;  %v1737_v41 = vadd.f32 %v1721_v44, %v1641_v36  ;;  %v1817_v61 = vmul.f32 %v1768_v34, %v3228_v10 }
 0x298   : > { %v1930_v31 = vadd.f32 %v1914_v30, %v1834_v53  ;;  %v3933_v35 = vpop.f32.mrb[7].mxu1  ;;  %v2238_v42 = vadd.f32 %v3844_v60, %v2215_v5  ;;  %v2056_v39 = vrot.slane %v3893_v52, %v3252_v25  ;;  %v1508_v43 = vrot.slane %v3927_v62, %v3234_v15 }
 0x299   : > { %v1588_v1 = vrot.slane %v3927_v62, %v3236_v16  ;;  %v1684_v32 = vrot.slane %v3927_v62, %v3238_v17  ;;  %v2202_v24 = vmul.f32 %v2156_v50, %v3282_v46  ;;  %v1833_v59 = vadd.f32 %v1817_v61, %v1737_v41 }
 0x29a   : > { %v2026_v48 = vadd.f32 %v2010_v3, %v1930_v31  ;;  %2254 = vst [vmem:[%s3855_s18 + $0x10] sm:$0xff] %v2238_v42  ;;  %v1913_v4 = vmul.f32 %v1864_v38, %v3232_v13  ;;  %v2152_v56 = vrot.slane %v3893_v52, %v3254_v26  ;;  %v1548_v0 = vmul.f32 %v1508_v43, %v3230_v12 }
 0x29b   : > { %v1628_v2 = vmul.f32 %v1588_v1, %v3242_v19  ;;  %v1780_v11 = vrot.slane %v3927_v62, %v3240_v18  ;;  %v2009_v14 = vmul.f32 %v1960_v22, %v3274_v40  ;;  %v2105_v63 = vmul.f32 %v2056_v39, %v3246_v21 }
 0x29c   : > { %v2122_v33 = vadd.f32 %v2106_v37, %v2026_v48  ;;  %v1929_v54 = vadd.f32 %v1913_v4, %v1833_v59  ;;  %v1876_v51 = vrot.slane %v3927_v62, %v3244_v20  ;;  %v1724_v52 = vmul.f32 %v1684_v32, %v3226_v9 }
 0x29d   : > { %v1644_v6 = vadd.f32 %v1628_v2, %v1548_v0  ;;  %v1972_v7 = vrot.slane %v3927_v62, %v3250_v23  ;;  %v1504_v58 = vrot.slane %v3933_v35, %v3234_v15  ;;  %v1584_v55 = vrot.slane %v3933_v35, %v3236_v16 }
 0x29e   : > { %v2218_v45 = vadd.f32 %v2202_v24, %v2122_v33  ;;  %v2025_v27 = vadd.f32 %v2009_v14, %v1929_v54  ;;  %v1680_v49 = vrot.slane %v3933_v35, %v3238_v17  ;;  %v1820_v47 = vmul.f32 %v1780_v11, %v3228_v10 }
 0x29f   : > { %v1740_v8 = vadd.f32 %v1724_v52, %v1644_v6  ;;  %v2068_v28 = vrot.slane %v3927_v62, %v3252_v25  ;;  %v2201_v53 = vmul.f32 %v2152_v56, %v3282_v46  ;;  %v1547_v30 = vmul.f32 %v1504_v58, %v3230_v12 }
 0x2a0   : > { %v2241_v57 = vadd.f32 %v3844_v60, %v2218_v45  ;;  %v2121_v29 = vadd.f32 %v2105_v63, %v2025_v27  ;;  %v1627_v50 = vmul.f32 %v1584_v55, %v3242_v19  ;;  %v1916_v5 = vmul.f32 %v1876_v51, %v3232_v13 }
 0x2a1   : > { %v1836_v34 = vadd.f32 %v1820_v47, %v1740_v8  ;;  %v2164_v36 = vrot.slane %v3927_v62, %v3254_v26  ;;  %v1776_v44 = vrot.slane %v3933_v35, %v3240_v18  ;;  %v1723_v37 = vmul.f32 %v1680_v49, %v3226_v9 }
 0x2a2   : > { %2257 = vst [vmem:[%s3855_s18 + $0x28] sm:$0xff] %v2241_v57  ;;  %v2217_v31 = vadd.f32 %v2201_v53, %v2121_v29  ;;  %v1643_v3 = vadd.f32 %v1627_v50, %v1547_v30  ;;  %v1872_v22 = vrot.slane %v3933_v35, %v3244_v20  ;;  %v2012_v61 = vmul.f32 %v1972_v7, %v3274_v40 }
 0x2a3   : > { %v1932_v41 = vadd.f32 %v1916_v5, %v1836_v34  ;;  %v2108_v62 = vmul.f32 %v2068_v28, %v3246_v21  ;;  %v1968_v39 = vrot.slane %v3933_v35, %v3250_v23  ;;  %v1819_v1 = vmul.f32 %v1776_v44, %v3228_v10 }
 0x2a4   : > { %v3980_v38 = vpop.f32.mrb[8].mxu1  ;;  %v2240_v48 = vadd.f32 %v3844_v60, %v2217_v31  ;;  %v1739_v43 = vadd.f32 %v1723_v37, %v1643_v3  ;;  %v2064_v32 = vrot.slane %v3933_v35, %v3252_v25  ;;  %v2204_v33 = vmul.f32 %v2164_v36, %v3282_v46 }
 0x2a5   : > { %v3985_v42 = vpop.f32.mrb[9].mxu1  ;;  %v2028_v24 = vadd.f32 %v2012_v61, %v1932_v41  ;;  %v1516_v59 = vrot.slane %v3980_v38, %v3234_v15  ;;  %v1596_v4 = vrot.slane %v3980_v38, %v3236_v16  ;;  %v1692_v56 = vrot.slane %v3980_v38, %v3238_v17 }
 0x2a6   : > { %2256 = vst [vmem:[%s3855_s18 + $0x20] sm:$0xff] %v2240_v48  ;;  %v1835_v0 = vadd.f32 %v1819_v1, %v1739_v43  ;;  %v1915_v2 = vmul.f32 %v1872_v22, %v3232_v13  ;;  %v2160_v11 = vrot.slane %v3933_v35, %v3254_v26  ;;  %v1788_v51 = vrot.slane %v3980_v38, %v3240_v18 }
 0x2a7   : > { %v2124_v54 = vadd.f32 %v2108_v62, %v2028_v24  ;;  %v1550_v14 = vmul.f32 %v1516_v59, %v3230_v12  ;;  %v1630_v63 = vmul.f32 %v1596_v4, %v3242_v19  ;;  %v2011_v6 = vmul.f32 %v1968_v39, %v3274_v40 }
 0x2a8   : > { %v1931_v45 = vadd.f32 %v1915_v2, %v1835_v0  ;;  %v2107_v52 = vmul.f32 %v2064_v32, %v3246_v21  ;;  %v1884_v7 = vrot.slane %v3980_v38, %v3244_v20  ;;  %v1726_v35 = vmul.f32 %v1692_v56, %v3226_v9 }
 0x2a9   : > { %v2220_v27 = vadd.f32 %v2204_v33, %v2124_v54  ;;  %v1646_v58 = vadd.f32 %v1630_v63, %v1550_v14  ;;  %v1980_v55 = vrot.slane %v3980_v38, %v3250_v23  ;;  %v1512_v57 = vrot.slane %v3985_v42, %v3234_v15 }
 0x2aa   : > { %v2027_v49 = vadd.f32 %v2011_v6, %v1931_v45  ;;  %v1592_v8 = vrot.slane %v3985_v42, %v3236_v16  ;;  %v1688_v47 = vrot.slane %v3985_v42, %v3238_v17  ;;  %v1822_v53 = vmul.f32 %v1788_v51, %v3228_v10 }
 0x2ab   : > { %v2243_v28 = vadd.f32 %v3844_v60, %v2220_v27  ;;  %v1742_v29 = vadd.f32 %v1726_v35, %v1646_v58  ;;  %v2076_v30 = vrot.slane %v3980_v38, %v3252_v25  ;;  %v2203_v34 = vmul.f32 %v2160_v11, %v3282_v46 }
 0x2ac   : > { %v2123_v50 = vadd.f32 %v2107_v52, %v2027_v49  ;;  %v1549_v5 = vmul.f32 %v1512_v57, %v3230_v12  ;;  %v1629_v36 = vmul.f32 %v1592_v8, %v3242_v19  ;;  %v1918_v31 = vmul.f32 %v1884_v7, %v3232_v13 }
 0x2ad   : > { %2259 = vst [vmem:[%s3855_s18 + $0x38] sm:$0xff] %v2243_v28  ;;  %v1838_v44 = vadd.f32 %v1822_v53, %v1742_v29  ;;  %v2172_v3 = vrot.slane %v3980_v38, %v3254_v26  ;;  %v1784_v37 = vrot.slane %v3985_v42, %v3240_v18  ;;  %v1725_v62 = vmul.f32 %v1688_v47, %v3226_v9 }
 0x2ae   : > { %v2219_v41 = vadd.f32 %v2203_v34, %v2123_v50  ;;  %v1645_v61 = vadd.f32 %v1629_v36, %v1549_v5  ;;  %v1880_v39 = vrot.slane %v3985_v42, %v3244_v20  ;;  %v2014_v1 = vmul.f32 %v1980_v55, %v3274_v40 }
 0x2af   : > { %v1934_v43 = vadd.f32 %v1918_v31, %v1838_v44  ;;  %v2110_v38 = vmul.f32 %v2076_v30, %v3246_v21  ;;  %v1976_v32 = vrot.slane %v3985_v42, %v3250_v23  ;;  %v1821_v4 = vmul.f32 %v1784_v37, %v3228_v10 }
 0x2b0   : > { %v2242_v24 = vadd.f32 %v3844_v60, %v2219_v41  ;;  %v1741_v59 = vadd.f32 %v1725_v62, %v1645_v61  ;;  %v2072_v56 = vrot.slane %v3985_v42, %v3252_v25  ;;  %v2206_v54 = vmul.f32 %v2172_v3, %v3282_v46 }
 0x2b1   : > { %v4036_v22 = vpop.f32.mrb[10].mxu1  ;;  %v2030_v33 = vadd.f32 %v2014_v1, %v1934_v43  ;;  %v1917_v63 = vmul.f32 %v1880_v39, %v3232_v13  ;;  %v2168_v51 = vrot.slane %v3985_v42, %v3254_v26  ;;  %v2013_v58 = vmul.f32 %v1976_v32, %v3274_v40 }
 0x2b2   : > { %v4041_v48 = vpop.f32.mrb[11].mxu1  ;;  %v1524_v0 = vrot.slane %v4036_v22, %v3234_v15  ;;  %v1604_v2 = vrot.slane %v4036_v22, %v3236_v16  ;;  %v1700_v11 = vrot.slane %v4036_v22, %v3238_v17  ;;  %2258 = vst [vmem:[%s3855_s18 + $0x30] sm:$0xff] %v2242_v24  ;;  %v1837_v14 = vadd.f32 %v1821_v4, %v1741_v59 }
 0x2b3   : > { %v2126_v45 = vadd.f32 %v2110_v38, %v2030_v33  ;;  %v1796_v7 = vrot.slane %v4036_v22, %v3240_v18  ;;  %v2109_v35 = vmul.f32 %v2072_v56, %v3246_v21  ;;  %v1892_v55 = vrot.slane %v4036_v22, %v3244_v20 }
 0x2b4   : > { %v1552_v6 = vmul.f32 %v1524_v0, %v3230_v12  ;;  %v1632_v52 = vmul.f32 %v1604_v2, %v3242_v19  ;;  %v1933_v27 = vadd.f32 %v1917_v63, %v1837_v14  ;;  %v1728_v42 = vmul.f32 %v1700_v11, %v3226_v9 }
 0x2b5   : > { %v2222_v49 = vadd.f32 %v2206_v54, %v2126_v45  ;;  %v1988_v8 = vrot.slane %v4036_v22, %v3250_v23  ;;  %v1520_v28 = vrot.slane %v4041_v48, %v3234_v15  ;;  %v1600_v29 = vrot.slane %v4041_v48, %v3236_v16 }
 0x2b6   : > { %v1648_v57 = vadd.f32 %v1632_v52, %v1552_v6  ;;  %v2029_v47 = vadd.f32 %v2013_v58, %v1933_v27  ;;  %v1696_v53 = vrot.slane %v4041_v48, %v3238_v17  ;;  %v1824_v34 = vmul.f32 %v1796_v7, %v3228_v10 }
 0x2b7   : > { %v2245_v30 = vadd.f32 %v3844_v60, %v2222_v49  ;;  %v2084_v5 = vrot.slane %v4036_v22, %v3252_v25  ;;  %v2205_v44 = vmul.f32 %v2168_v51, %v3282_v46  ;;  %v1551_v31 = vmul.f32 %v1520_v28, %v3230_v12 }
 0x2b8   : > { %v1744_v50 = vadd.f32 %v1728_v42, %v1648_v57  ;;  %v2125_v36 = vadd.f32 %v2109_v35, %v2029_v47  ;;  %v1631_v3 = vmul.f32 %v1600_v29, %v3242_v19  ;;  %v1920_v61 = vmul.f32 %v1892_v55, %v3232_v13 }
 0x2b9   : > { %2261 = vst [vmem:[%s3855_s18 + $0x48] sm:$0xff] %v2245_v30  ;;  %v2180_v62 = vrot.slane %v4036_v22, %v3254_v26  ;;  %v1792_v39 = vrot.slane %v4041_v48, %v3240_v18  ;;  %v1727_v32 = vmul.f32 %v1696_v53, %v3226_v9  ;;  %v1888_v24 = vrot.slane %v4041_v48, %v3244_v20 }
 0x2ba   : > { %v1840_v41 = vadd.f32 %v1824_v34, %v1744_v50  ;;  %v2221_v1 = vadd.f32 %v2205_v44, %v2125_v36  ;;  %v1647_v38 = vadd.f32 %v1631_v3, %v1551_v31  ;;  %v2016_v4 = vmul.f32 %v1988_v8, %v3274_v40 }
 0x2bb   : > { %v2112_v56 = vmul.f32 %v2084_v5, %v3246_v21  ;;  %v1984_v22 = vrot.slane %v4041_v48, %v3250_v23  ;;  %v1823_v2 = vmul.f32 %v1792_v39, %v3228_v10  ;;  %v2080_v11 = vrot.slane %v4041_v48, %v3252_v25 }
 0x2bc   : > { %v1936_v59 = vadd.f32 %v1920_v61, %v1840_v41  ;;  %v2244_v33 = vadd.f32 %v3844_v60, %v2221_v1  ;;  %v1743_v0 = vadd.f32 %v1727_v32, %v1647_v38  ;;  %v2208_v45 = vmul.f32 %v2180_v62, %v3282_v46 }
 0x2bd   : > { %v1919_v52 = vmul.f32 %v1888_v24, %v3232_v13  ;;  %v2176_v7 = vrot.slane %v4041_v48, %v3254_v26  ;;  %v2015_v57 = vmul.f32 %v1984_v22, %v3274_v40  ;;  %v2111_v42 = vmul.f32 %v2080_v11, %v3246_v21 }
 0x2be   : > { %v4086_v37 = vpop.f32.mrb[12].mxu1  ;;  %v2032_v54 = vadd.f32 %v2016_v4, %v1936_v59  ;;  %2260 = vst [vmem:[%s3855_s18 + $0x40] sm:$0xff] %v2244_v33  ;;  %v1839_v6 = vadd.f32 %v1823_v2, %v1743_v0 }
 0x2bf   : > { %v4094_v43 = vpop.f32.mrb[13].mxu1  ;;  %v1532_v14 = vrot.slane %v4086_v37, %v3234_v15  ;;  %v1612_v63 = vrot.slane %v4086_v37, %v3236_v16  ;;  %v1708_v51 = vrot.slane %v4086_v37, %v3238_v17  ;;  %v1804_v55 = vrot.slane %v4086_v37, %v3240_v18 }
 0x2c0   : > { %v2128_v27 = vadd.f32 %v2112_v56, %v2032_v54  ;;  %v1935_v49 = vadd.f32 %v1919_v52, %v1839_v6  ;;  %v1900_v8 = vrot.slane %v4086_v37, %v3244_v20  ;;  %v1996_v29 = vrot.slane %v4086_v37, %v3250_v23 }
 0x2c1   : > { %v1554_v58 = vmul.f32 %v1532_v14, %v3230_v12  ;;  %v1634_v35 = vmul.f32 %v1612_v63, %v3242_v19  ;;  %v1730_v48 = vmul.f32 %v1708_v51, %v3226_v9  ;;  %v1528_v50 = vrot.slane %v4094_v43, %v3234_v15 }
 0x2c2   : > { %v2224_v47 = vadd.f32 %v2208_v45, %v2128_v27  ;;  %v2031_v30 = vadd.f32 %v2015_v57, %v1935_v49  ;;  %v1608_v34 = vrot.slane %v4094_v43, %v3236_v16  ;;  %v1704_v5 = vrot.slane %v4094_v43, %v3238_v17 }
 0x2c3   : > { %v1650_v28 = vadd.f32 %v1634_v35, %v1554_v58  ;;  %v1826_v3 = vmul.f32 %v1804_v55, %v3228_v10  ;;  %v2092_v41 = vrot.slane %v4086_v37, %v3252_v25  ;;  %v2207_v62 = vmul.f32 %v2176_v7, %v3282_v46 }
 0x2c4   : > { %v2247_v44 = vadd.f32 %v3844_v60, %v2224_v47  ;;  %v2127_v61 = vadd.f32 %v2111_v42, %v2031_v30  ;;  %v1553_v39 = vmul.f32 %v1528_v50, %v3230_v12  ;;  %v1633_v1 = vmul.f32 %v1608_v34, %v3242_v19 }
 0x2c5   : > { %v1746_v31 = vadd.f32 %v1730_v48, %v1650_v28  ;;  %v1922_v32 = vmul.f32 %v1900_v8, %v3232_v13  ;;  %v2188_v24 = vrot.slane %v4086_v37, %v3254_v26  ;;  %v1800_v59 = vrot.slane %v4094_v43, %v3240_v18 }
 0x2c6   : > { %2263 = vst [vmem:[%s3855_s18 + $0x58] sm:$0xff] %v2247_v44  ;;  %v2223_v4 = vadd.f32 %v2207_v62, %v2127_v61  ;;  %v1649_v56 = vadd.f32 %v1633_v1, %v1553_v39  ;;  %v1729_v22 = vmul.f32 %v1704_v5, %v3226_v9  ;;  %v1896_v33 = vrot.slane %v4094_v43, %v3244_v20 }
 0x2c7   : > { %v1842_v38 = vadd.f32 %v1826_v3, %v1746_v31  ;;  %v2018_v2 = vmul.f32 %v1996_v29, %v3274_v40  ;;  %v2114_v11 = vmul.f32 %v2092_v41, %v3246_v21  ;;  %v1992_v54 = vrot.slane %v4094_v43, %v3250_v23 }
 0x2c8   : > { %v2246_v37 = vadd.f32 %v3844_v60, %v2223_v4  ;;  %v1745_v14 = vadd.f32 %v1729_v22, %v1649_v56  ;;  %v1825_v63 = vmul.f32 %v1800_v59, %v3228_v10  ;;  %v2088_v51 = vrot.slane %v4094_v43, %v3252_v25 }
 0x2c9   : > { %v4129_v53 = vpop.f32.mrb[14].mxu1  ;;  %v1938_v0 = vadd.f32 %v1922_v32, %v1842_v38  ;;  %v2210_v27 = vmul.f32 %v2188_v24, %v3282_v46  ;;  %v1921_v35 = vmul.f32 %v1896_v33, %v3232_v13  ;;  %v2017_v47 = vmul.f32 %v1992_v54, %v3274_v40 }
 0x2ca   : > { %v4137_v36 = vpop.f32.mrb[15].mxu1  ;;  %v1540_v6 = vrot.slane %v4129_v53, %v3234_v15  ;;  %v1620_v52 = vrot.slane %v4129_v53, %v3236_v16  ;;  %v1716_v7 = vrot.slane %v4129_v53, %v3238_v17  ;;  %2262 = vst [vmem:[%s3855_s18 + $0x50] sm:$0xff] %v2246_v37  ;;  %v1841_v58 = vadd.f32 %v1825_v63, %v1745_v14 }
 0x2cb   : > { %v2034_v45 = vadd.f32 %v2018_v2, %v1938_v0  ;;  %v1812_v42 = vrot.slane %v4129_v53, %v3240_v18  ;;  %v2113_v28 = vmul.f32 %v2088_v51, %v3246_v21  ;;  %v2184_v48 = vrot.slane %v4094_v43, %v3254_v26 }
 0x2cc   : > { %v1556_v49 = vmul.f32 %v1540_v6, %v3230_v12  ;;  %v1636_v57 = vmul.f32 %v1620_v52, %v3242_v19  ;;  %v1937_v8 = vadd.f32 %v1921_v35, %v1841_v58  ;;  %v1732_v50 = vmul.f32 %v1716_v7, %v3226_v9 }
 0x2cd   : > { %v2130_v55 = vadd.f32 %v2114_v11, %v2034_v45  ;;  %v1908_v34 = vrot.slane %v4129_v53, %v3244_v20  ;;  %v1536_v44 = vrot.slane %v4137_v36, %v3234_v15  ;;  %v1616_v31 = vrot.slane %v4137_v36, %v3236_v16 }
 0x2ce   : > { %v1652_v30 = vadd.f32 %v1636_v57, %v1556_v49  ;;  %v2033_v5 = vadd.f32 %v2017_v47, %v1937_v8  ;;  %v1712_v3 = vrot.slane %v4137_v36, %v3238_v17  ;;  %v1828_v61 = vmul.f32 %v1812_v42, %v3228_v10 }
 0x2cf   : > { %v2226_v29 = vadd.f32 %v2210_v27, %v2130_v55  ;;  %v2004_v62 = vrot.slane %v4129_v53, %v3250_v23  ;;  %v2209_v1 = vmul.f32 %v2184_v48, %v3282_v46  ;;  %v1555_v38 = vmul.f32 %v1536_v44, %v3230_v12 }
 0x2d0   : > { %v1748_v41 = vadd.f32 %v1732_v50, %v1652_v30  ;;  %v2129_v39 = vadd.f32 %v2113_v28, %v2033_v5  ;;  %v1635_v15 = vmul.f32 %v1616_v31, %v3242_v19  ;;  %v1924_v32 = vmul.f32 %v1908_v34, %v3232_v13 }
 0x2d1   : > { %v2249_v43 = vadd.f32 %v3844_v60, %v2226_v29  ;;  %v2100_v17 = vrot.slane %v4129_v53, %v3252_v25  ;;  %v1808_v24 = vrot.slane %v4137_v36, %v3240_v18  ;;  %v1731_v56 = vmul.f32 %v1712_v3, %v3226_v9 }
 0x2d2   : > { %v1844_v16 = vadd.f32 %v1828_v61, %v1748_v41  ;;  %v2225_v59 = vadd.f32 %v2209_v1, %v2129_v39  ;;  %v1651_v4 = vadd.f32 %v1635_v15, %v1555_v38  ;;  %v1904_v12 = vrot.slane %v4137_v36, %v3244_v20 }
 0x2d3   : > { %2265 = vst [vmem:[%s3855_s18 + $0x68] sm:$0xff] %v2249_v43  ;;  %v2020_v19 = vmul.f32 %v2004_v62, %v3274_v40  ;;  %v2196_v33 = vrot.slane %v4129_v53, %v3254_v26  ;;  %v1827_v11 = vmul.f32 %v1808_v24, %v3228_v10  ;;  %v2000_v18 = vrot.slane %v4137_v36, %v3250_v23 }
 0x2d4   : > { %v1940_v22 = vadd.f32 %v1924_v32, %v1844_v16  ;;  %v2248_v0 = vadd.f32 %v3844_v60, %v2225_v59  ;;  %v1747_v2 = vadd.f32 %v1731_v56, %v1651_v4  ;;  %v2116_v9 = vmul.f32 %v2100_v17, %v3246_v21 }
 0x2d5   : > { %v1923_v37 = vmul.f32 %v1904_v12, %v3232_v13  ;;  %v2096_v53 = vrot.slane %v4137_v36, %v3252_v25  ;;  %v2212_v63 = vmul.f32 %v2196_v33, %v3282_v46  ;;  %v2019_v23 = vmul.f32 %v2000_v18, %v3274_v40 }
 0x2d6   : > { %v2036_v54 = vadd.f32 %v2020_v19, %v1940_v22  ;;  %2264 = vst [vmem:[%s3855_s18 + $0x60] sm:$0xff] %v2248_v0  ;;  %v1843_v20 = vadd.f32 %v1827_v11, %v1747_v2  ;;  %v2192_v51 = vrot.slane %v4137_v36, %v3254_v26 }
 0x2d7   : > { %v2115_v52 = vmul.f32 %v2096_v53, %v3246_v21 }
 0x2d8   : > { %v2132_v14 = vadd.f32 %v2116_v9, %v2036_v54  ;;  %v1939_v10 = vadd.f32 %v1923_v37, %v1843_v20  ;;  %v2211_v25 = vmul.f32 %v2192_v51, %v3282_v46 }
 0x2da   : > { %v2228_v45 = vadd.f32 %v2212_v63, %v2132_v14  ;;  %v2035_v6 = vadd.f32 %v2019_v23, %v1939_v10 }
 0x2dc   : > { %v2251_v13 = vadd.f32 %v3844_v60, %v2228_v45  ;;  %v2131_v7 = vadd.f32 %v2115_v52, %v2035_v6 }
 0x2de   : > { %2267 = vst [vmem:[%s3855_s18 + $0x78] sm:$0xff] %v2251_v13  ;;  %v2227_v27 = vadd.f32 %v2211_v25, %v2131_v7 }
 0x2e0   : > { %v2250_v21 = vadd.f32 %v3844_v60, %v2227_v27 }
 0x2e2   : > { %2266 = vst [vmem:[%s3855_s18 + $0x70] sm:$0xff] %v2250_v21 }
 0x2e3   : > { %2875 = shalt.err (!%p2872_p6)
}
 0x2e4   : > { %s2876_s20 = scalar_lea.hbm %s4230_s19, 2048  ;;  %s2880_s8 = scalar_lea.hbm %s4286_s6, 4096 }
 0x2e5   : > { %p2877_p13 = scmp.ne.s32.totalorder %s4230_s19, %s2876_s20  ;;  %p2881_p9 = scmp.lt.u32.totalorder %s4230_s19, %s4286_s6 }
 0x2e6   : > { %p2882_p10 = scmp.lt.u32.totalorder %s2880_s8, %s2876_s20  ;;  %p2884_p4 = scmp.lt.u32.totalorder %s2876_s20, %s4230_s19 }
 0x2e7   : > { %p2878_p8 = pnand %p2877_p13, %p4340_p0 }
 0x2e8   : > { %p2883_p1 = por %p2882_p10, %p2881_p9 }
 0x2e9   : > { %p2879_p7 = pneg %p2878_p8 }
 0x2ea   : > { %p2885_p2 = por %p2884_p4, %p2883_p1 }
 0x2ec   : > { %p2886_p5 = pnand %p2885_p2, %p2879_p7 }
 0x2ee   : > { %2889 = shalt.err (!%p2886_p5)
}
 0x2ef   : > { %s2957_s16 = smov 128   ;;  %s2958_s18 = smov 8  }
 0x2f0   : > { %2664 = dma.vmem_to_hbm [thread:$0]  (%p4340_p0), %s4232_s13, 2048, %s4230_s19, %s4238_s14, %s2957_s16, %s2957_s16, %s2958_s18  }
 0x2f1 PF: > { %s2297_s15 = sand.u32 1, %s2928_s21   ;;  %p4341_p11 = scmp.ne.s32.totalorder %s4303_s10, 0 }
 0x2f2   : > { %p4342_p12 = scmp.ge.s32.totalorder %s2940_s24, 2  ;;  %s2298_s7 = scalar_lea.sflag [#allocation4], %s2297_s15 }
 0x2f4   : > { %p2681_p3 = pnand %p4342_p12, %p4341_p11 }
 0x2f6   : > { %2923 = dma.done.wait (!%p2681_p3), %s2298_s7, 2048  }
 0x2f7   : > { %2925 = vsyncadd (!%p2681_p3), %s2298_s7, 4294965248  ;;  %s4343_s24 = sld [smem:[#allocation16_spill]]  ;;  %s4344_s12 = sld [smem:[#allocation17_spill]] }
 0x2f8   : > { %s4345_s21 = smov %s2932_s22  ;;  %s4346_s22 = smov %s2936_s23 }
 0x2fd   : > { %p21_p6 = scmp.ge.s32.totalorder %s4343_s24, 4   ;;  %s4347_s23 = smov %s4344_s12 }
 0x2ff   :  { %23 = sbr.rel (!%p21_p6) target bundleno = 7 (0x7), region = 102 }
 0x306   :  { %2303 = vsyncpa [#allocation3], 1 }
 0x307   :  { %2305 = vsyncpa [#allocation3 + $0x1], 1 }
 0x308   :  { %2306 = vsyncpa [#allocation6], 1 }
 0x309   :  { %2308 = vsyncpa [#allocation6 + $0x1], 1 }
 0x30a   :  { %2309 = vsyncpa [#allocation9], 1 }
 0x30b   :  { %2310 = vsyncpa [#allocation4], 1 }
 0x30c   :  { %2312 = vsyncpa [#allocation4 + $0x1], 1 }

</bundles_post_ra>
